<compile_context>
chip_gen: v7x
topology: tpu7x:2x2x1
jax: 0.10.0
libtpu: 0.0.40
codegen_flags: <defaults>
</compile_context>

<pallas_src>
import functools

import jax
import jax.numpy as jnp
import numpy as np
from jax.experimental import pallas as pl
from jax.experimental.pallas import tpu as pltpu


def _round_up(x, m):
    return (x + m - 1) // m * m


def _postnet_kernel(n_layers, x_ref, *refs):
    """refs = [w_0, b_0, ..., w_{L-1}, b_{L-1}, out_ref, hpad_ref, acc_ref].

    w_i:  (K, Cp_in_i, Cp_out_i) bf16, BN folded in, channels zero-padded to 128.
    b_i:  (1, Cp_out_i) f32 fused bias (zero in padded columns).
    hpad_ref: (T + 2*p, Cp_max) bf16 scratch, zero-halo-padded layer input.
    acc_ref:  (T, Cp_acc_max) f32 accumulator scratch.
    """
    ws = [refs[2 * i] for i in range(n_layers)]
    bs = [refs[2 * i + 1] for i in range(n_layers)]
    out_ref = refs[2 * n_layers]
    hpad_ref = refs[2 * n_layers + 1]
    acc_ref = refs[2 * n_layers + 2]

    T = x_ref.shape[1]
    c0 = x_ref.shape[2]
    K = ws[0].shape[0]
    p = (K - 1) // 2
    cmax = hpad_ref.shape[1]
    cp0 = ws[0].shape[1]           # padded input width of layer 0

    # Zero the halo rows once (full width); interior rows are rewritten every
    # layer, so the halo stays zero for the whole stack.
    if p > 0:
        hpad_ref[0:p, :] = jnp.zeros((p, cmax), hpad_ref.dtype)
        hpad_ref[T + p:T + 2 * p, :] = jnp.zeros((p, cmax), hpad_ref.dtype)

    # Layer-0 input: cast to bf16, zero the channel-pad columns up to cp0.
    hpad_ref[p:p + T, :c0] = x_ref[0].astype(hpad_ref.dtype)
    if cp0 > c0:
        hpad_ref[p:p + T, c0:cp0] = jnp.zeros((T, cp0 - c0), hpad_ref.dtype)
    # NOTE: hpad columns beyond the current layer's (padded) output width may
    # hold stale data from a previous layer / grid step; they are never read
    # because layer i+1 reads exactly :Cp_out_i, which layer i fully rewrote.

    for li in range(n_layers):
        w_ref = ws[li]
        cin_p = w_ref.shape[1]
        cout_p = w_ref.shape[2]

        # K accumulating MXU dots (bf16 x bf16 -> f32) into the f32 scratch:
        # k = 0 assigns (no separate zero-init), k = 1..K-1 accumulate.
        acc_ref[:, :cout_p] = jnp.dot(
            hpad_ref[0:T, :cin_p], w_ref[0],
            preferred_element_type=jnp.float32)
        for k in range(1, K):
            acc_ref[:, :cout_p] += jnp.dot(
                hpad_ref[k:k + T, :cin_p], w_ref[k],
                preferred_element_type=jnp.float32)

        h = acc_ref[:, :cout_p] + bs[li][...]        # f32 fused (conv+BN) bias
        if li < n_layers - 1:
            h = jnp.tanh(h)                          # dropout: identity (eval)
            # Pad columns of h are exactly 0 (zero weight cols / zero bias), so
            # the next layer's zero-padded input channels stay zero.
            hpad_ref[p:p + T, :cout_p] = h.astype(hpad_ref.dtype)
        else:
            out_ref[0] = h.astype(out_ref.dtype)     # last layer: no tanh


def postnet_forward(x, layers, eps=1e-5, lane=128):
    """x: (B, T, n_channels) f32.

    layers: list of dicts, one per conv layer, with:
      'w' (C_out, C_in, K) torch Conv1d weight, 'b' (C_out,) conv bias,
      'gamma','beta','mean','var' (C_out,) BatchNorm1d affine + running stats.
    Returns (B, T, n_channels) f32.
    """
    B, T, c0 = x.shape
    n_layers = len(layers)
    K = layers[0]['w'].shape[2]
    assert K % 2 == 1, "odd kernel_size required to match PyTorch 'same' padding"
    p = (K - 1) // 2

    # Fold eval-mode BatchNorm into the conv weight/bias, reshape the weight to
    # (K, C_in, C_out), zero-pad channels to lane multiples, cast weights bf16.
    ws, bs = [], []
    c_in = c0
    cmax_hpad = _round_up(c0, lane)   # widest (padded) layer *input* width
    cmax_acc = 0                      # widest (padded) layer *output* width
    for i, lp in enumerate(layers):
        c_out, c_in_l, k_l = lp['w'].shape
        assert k_l == K and c_in_l == c_in
        cp_in = _round_up(c_in, lane)
        cp_out = _round_up(c_out, lane)
        scale = lp['gamma'] / jnp.sqrt(lp['var'] + eps)              # (C_out,)
        w_kic = jnp.transpose(lp['w'], (2, 1, 0)) * scale[None, None, :]
        w_pad = jnp.zeros((K, cp_in, cp_out), jnp.bfloat16)
        w_pad = w_pad.at[:, :c_in, :c_out].set(w_kic.astype(jnp.bfloat16))
        b_fold = (lp['b'] - lp['mean']) * scale + lp['beta']
        b_pad = jnp.zeros((1, cp_out), jnp.float32)
        b_pad = b_pad.at[:, :c_out].set(b_fold.astype(jnp.float32))
        ws.append(w_pad)
        bs.append(b_pad)
        cmax_acc = max(cmax_acc, cp_out)
        if i < n_layers - 1:
            cmax_hpad = max(cmax_hpad, cp_out)
        c_in = c_out
    c_last = layers[-1]['w'].shape[0]
    cp_last = _round_up(c_last, lane)

    rep3 = lambda b: (0, 0, 0)
    rep2 = lambda b: (0, 0)
    in_specs = [pl.BlockSpec((1, T, c0), lambda b: (b, 0, 0))]
    operands = [x.astype(jnp.float32)]
    for w3, b2 in zip(ws, bs):
        in_specs.append(pl.BlockSpec(w3.shape, rep3))
        in_specs.append(pl.BlockSpec(b2.shape, rep2))
        operands += [w3, b2]

    kern = functools.partial(_postnet_kernel, n_layers)
    out = pl.pallas_call(
        kern,
        out_shape=jax.ShapeDtypeStruct((B, T, cp_last), jnp.float32),
        grid_spec=pltpu.PrefetchScalarGridSpec(
            num_scalar_prefetch=0,
            grid=(B,),
            in_specs=in_specs,
            out_specs=pl.BlockSpec((1, T, cp_last), lambda b: (b, 0, 0)),
            scratch_shapes=[
                pltpu.VMEM((T + 2 * p, cmax_hpad), jnp.bfloat16),  # halo input
                pltpu.VMEM((T, cmax_acc), jnp.float32),            # accumulator
            ],
        ),
        compiler_params=pltpu.CompilerParams(
            dimension_semantics=("parallel",),        # batch elems independent
            vmem_limit_bytes=48 * 1024 * 1024,        # room for dbuf'd bf16 weights
        ),
    )(*operands)
    return out[..., :c_last]   # drop lane-padding columns (exactly zero)


# ---------------- pure-JAX reference (for correctness check) ----------------
def _conv1d_ref(x, w, b, pad):
    # x: (B, T, C_in) channels-last; w: (C_out, C_in, K) torch layout.
    K = w.shape[2]
    T = x.shape[1]
    xp = jnp.pad(x, ((0, 0), (pad, pad), (0, 0)))
    acc = jnp.zeros((x.shape[0], T, w.shape[0]), jnp.float32)
    for k in range(K):
        acc = acc + jnp.einsum('btc,oc->bto', xp[:, k:k + T, :], w[:, :, k],
                               precision=jax.lax.Precision.HIGHEST)
    return acc + b


def _batchnorm_ref(x, lp, eps):
    return (x - lp['mean']) / jnp.sqrt(lp['var'] + eps) * lp['gamma'] + lp['beta']


def postnet_ref(x, layers, eps=1e-5):
    h = x
    n = len(layers)
    for i, lp in enumerate(layers):
        pad = (lp['w'].shape[2] - 1) // 2
        h = _conv1d_ref(h, lp['w'], lp['b'], pad)
        h = _batchnorm_ref(h, lp, eps)
        if i < n - 1:
            h = jnp.tanh(h)
    # dropout: identity at inference
    return h


if __name__ == "__main__":
    B, T = 2, 16
    n_channels, embedding_dim, kernel_size, conv_layers = 16, 32, 5, 5

    key = jax.random.PRNGKey(0)
    layers = []
    c_in = n_channels
    for i in range(conv_layers):
        c_out = embedding_dim if i < conv_layers - 1 else n_channels
        key, kw, kb, kg, kbe, km, kv = jax.random.split(key, 7)
        layers.append({
            'w': 0.1 * jax.random.normal(kw, (c_out, c_in, kernel_size), jnp.float32),
            'b': 0.1 * jax.random.normal(kb, (c_out,), jnp.float32),
            'gamma': 1.0 + 0.1 * jax.random.normal(kg, (c_out,), jnp.float32),
            'beta': 0.1 * jax.random.normal(kbe, (c_out,), jnp.float32),
            'mean': 0.1 * jax.random.normal(km, (c_out,), jnp.float32),
            'var': 0.5 + jnp.abs(jax.random.normal(kv, (c_out,), jnp.float32)),
        })
        c_in = c_out

    key, kx = jax.random.split(key)
    x = jax.random.normal(kx, (B, T, n_channels), jnp.float32)

    out = jax.block_until_ready(postnet_forward(x, layers))
    assert out.shape == (B, T, n_channels)

    ref = postnet_ref(x, layers)
    # bf16-class accuracy explicitly accepted (bf16 weights/activations on the
    # MXU; f32 default-precision dots round through bf16 anyway).
    max_err = float(jnp.max(jnp.abs(out - ref)))
    assert np.isfinite(max_err) and max_err < 3e-2, f"max abs err {max_err}"

    print("KERNEL_OK")
</pallas_src>

<mosaic_0001>
module attributes {stable_mosaic.version = 11 : i64} {
  func.func @_postnet_kernel(%arg0: i32, %arg1: memref<1x16x16xf32, #tpu.memory_space<vmem>>, %arg2: memref<5x128x128xbf16, #tpu.memory_space<vmem>>, %arg3: memref<1x128xf32, #tpu.memory_space<vmem>>, %arg4: memref<5x128x128xbf16, #tpu.memory_space<vmem>>, %arg5: memref<1x128xf32, #tpu.memory_space<vmem>>, %arg6: memref<5x128x128xbf16, #tpu.memory_space<vmem>>, %arg7: memref<1x128xf32, #tpu.memory_space<vmem>>, %arg8: memref<5x128x128xbf16, #tpu.memory_space<vmem>>, %arg9: memref<1x128xf32, #tpu.memory_space<vmem>>, %arg10: memref<5x128x128xbf16, #tpu.memory_space<vmem>>, %arg11: memref<1x128xf32, #tpu.memory_space<vmem>>, %arg12: memref<1x16x128xf32, #tpu.memory_space<vmem>>, %arg13: memref<20x128xbf16, #tpu.memory_space<vmem>>, %arg14: memref<16x128xf32, #tpu.memory_space<vmem>>) attributes {dimension_semantics = [#tpu.dimension_semantics<parallel>], iteration_bounds = array<i64: 2>, scalar_prefetch = 0 : i64, scratch_operands = 2 : i64, tpu.core_type = #tpu.core_type<tc>, window_params = [{transform_indices = @transform_0, window_bounds = array<i64: 1, 16, 16>}, {pipeline_mode = #tpu.pipeline_mode<synchronous>, transform_indices = @transform_1, window_bounds = array<i64: 5, 128, 128>}, {pipeline_mode = #tpu.pipeline_mode<synchronous>, transform_indices = @transform_2, window_bounds = array<i64: 1, 128>}, {pipeline_mode = #tpu.pipeline_mode<synchronous>, transform_indices = @transform_3, window_bounds = array<i64: 5, 128, 128>}, {pipeline_mode = #tpu.pipeline_mode<synchronous>, transform_indices = @transform_4, window_bounds = array<i64: 1, 128>}, {pipeline_mode = #tpu.pipeline_mode<synchronous>, transform_indices = @transform_5, window_bounds = array<i64: 5, 128, 128>}, {pipeline_mode = #tpu.pipeline_mode<synchronous>, transform_indices = @transform_6, window_bounds = array<i64: 1, 128>}, {pipeline_mode = #tpu.pipeline_mode<synchronous>, transform_indices = @transform_7, window_bounds = array<i64: 5, 128, 128>}, {pipeline_mode = #tpu.pipeline_mode<synchronous>, transform_indices = @transform_8, window_bounds = array<i64: 1, 128>}, {pipeline_mode = #tpu.pipeline_mode<synchronous>, transform_indices = @transform_9, window_bounds = array<i64: 5, 128, 128>}, {pipeline_mode = #tpu.pipeline_mode<synchronous>, transform_indices = @transform_10, window_bounds = array<i64: 1, 128>}, {transform_indices = @transform_11, window_bounds = array<i64: 1, 16, 128>}]} {
    %cst = arith.constant 0.000000e+00 : bf16
    %0 = vector.broadcast %cst : bf16 to vector<2x128xbf16>
    %c0 = arith.constant 0 : index
    %c0_0 = arith.constant 0 : index
    %1 = vector.load %arg13[%c0, %c0_0] : memref<20x128xbf16, #tpu.memory_space<vmem>>, vector<2x128xbf16>
    tpu.vector_store %arg13[%c0, %c0_0], %0 {strides = array<i32>} : memref<20x128xbf16, #tpu.memory_space<vmem>>, vector<2x128xbf16>,
    %cst_1 = arith.constant 0.000000e+00 : bf16
    %2 = vector.broadcast %cst_1 : bf16 to vector<2x128xbf16>
    %c18 = arith.constant 18 : index
    %c0_2 = arith.constant 0 : index
    %3 = vector.load %arg13[%c18, %c0_2] : memref<20x128xbf16, #tpu.memory_space<vmem>>, vector<2x128xbf16>
    tpu.vector_store %arg13[%c18, %c0_2], %2 {strides = array<i32>} : memref<20x128xbf16, #tpu.memory_space<vmem>>, vector<2x128xbf16>,
    %c0_3 = arith.constant 0 : index
    %c0_4 = arith.constant 0 : index
    %c0_5 = arith.constant 0 : index
    %4 = vector.load %arg1[%c0_3, %c0_4, %c0_5] : memref<1x16x16xf32, #tpu.memory_space<vmem>>, vector<1x16x16xf32>
    %5 = vector.shape_cast %4 : vector<1x16x16xf32> to vector<16x16xf32>
    %6 = arith.truncf %5 : vector<16x16xf32> to vector<16x16xbf16>
    %c2 = arith.constant 2 : index
    %c0_6 = arith.constant 0 : index
    %7 = vector.load %arg13[%c2, %c0_6] : memref<20x128xbf16, #tpu.memory_space<vmem>>, vector<16x16xbf16>
    tpu.vector_store %arg13[%c2, %c0_6], %6 {strides = array<i32>} : memref<20x128xbf16, #tpu.memory_space<vmem>>, vector<16x16xbf16>,
    %cst_7 = arith.constant 0.000000e+00 : bf16
    %8 = vector.broadcast %cst_7 : bf16 to vector<16x112xbf16>
    %c2_8 = arith.constant 2 : index
    %c16 = arith.constant 16 : index
    %9 = vector.load %arg13[%c2_8, %c16] : memref<20x128xbf16, #tpu.memory_space<vmem>>, vector<16x112xbf16>
    tpu.vector_store %arg13[%c2_8, %c16], %8 {strides = array<i32>} : memref<20x128xbf16, #tpu.memory_space<vmem>>, vector<16x112xbf16>,
    %c0_9 = arith.constant 0 : index
    %c0_10 = arith.constant 0 : index
    %10 = vector.load %arg13[%c0_9, %c0_10] : memref<20x128xbf16, #tpu.memory_space<vmem>>, vector<16x128xbf16>
    %c0_11 = arith.constant 0 : index
    %c0_12 = arith.constant 0 : index
    %c0_13 = arith.constant 0 : index
    %11 = vector.load %arg2[%c0_11, %c0_12, %c0_13] : memref<5x128x128xbf16, #tpu.memory_space<vmem>>, vector<1x128x128xbf16>
    %12 = vector.shape_cast %11 : vector<1x128x128xbf16> to vector<128x128xbf16>
    %cst_14 = arith.constant dense<0.000000e+00> : vector<16x128xf32>
    %13 = tpu.matmul %10, %12, %cst_14 {dimension_numbers = #tpu.dot_dimension_numbers<[1], [0], [0], [1], [0, 0, 1, 1], [], []>} : vector<16x128xbf16>, vector<128x128xbf16>, vector<16x128xf32> -> vector<16x128xf32>
    %c0_15 = arith.constant 0 : index
    %c0_16 = arith.constant 0 : index
    %14 = vector.load %arg14[%c0_15, %c0_16] : memref<16x128xf32, #tpu.memory_space<vmem>>, vector<16x128xf32>
    tpu.vector_store %arg14[%c0_15, %c0_16], %13 {strides = array<i32>} : memref<16x128xf32, #tpu.memory_space<vmem>>, vector<16x128xf32>,
    %c0_17 = arith.constant 0 : index
    %c0_18 = arith.constant 0 : index
    %15 = vector.load %arg14[%c0_17, %c0_18] : memref<16x128xf32, #tpu.memory_space<vmem>>, vector<16x128xf32>
    %c1 = arith.constant 1 : index
    %c0_19 = arith.constant 0 : index
    %16 = vector.load %arg13[%c1, %c0_19] : memref<20x128xbf16, #tpu.memory_space<vmem>>, vector<16x128xbf16>
    %c1_20 = arith.constant 1 : index
    %c0_21 = arith.constant 0 : index
    %c0_22 = arith.constant 0 : index
    %17 = vector.load %arg2[%c1_20, %c0_21, %c0_22] : memref<5x128x128xbf16, #tpu.memory_space<vmem>>, vector<1x128x128xbf16>
    %18 = vector.shape_cast %17 : vector<1x128x128xbf16> to vector<128x128xbf16>
    %cst_23 = arith.constant dense<0.000000e+00> : vector<16x128xf32>
    %19 = tpu.matmul %16, %18, %cst_23 {dimension_numbers = #tpu.dot_dimension_numbers<[1], [0], [0], [1], [0, 0, 1, 1], [], []>} : vector<16x128xbf16>, vector<128x128xbf16>, vector<16x128xf32> -> vector<16x128xf32>
    %20 = arith.addf %15, %19 : vector<16x128xf32>
    %c0_24 = arith.constant 0 : index
    %c0_25 = arith.constant 0 : index
    %21 = vector.load %arg14[%c0_24, %c0_25] : memref<16x128xf32, #tpu.memory_space<vmem>>, vector<16x128xf32>
    tpu.vector_store %arg14[%c0_24, %c0_25], %20 {strides = array<i32>} : memref<16x128xf32, #tpu.memory_space<vmem>>, vector<16x128xf32>,
    %c0_26 = arith.constant 0 : index
    %c0_27 = arith.constant 0 : index
    %22 = vector.load %arg14[%c0_26, %c0_27] : memref<16x128xf32, #tpu.memory_space<vmem>>, vector<16x128xf32>
    %c2_28 = arith.constant 2 : index
    %c0_29 = arith.constant 0 : index
    %23 = vector.load %arg13[%c2_28, %c0_29] : memref<20x128xbf16, #tpu.memory_space<vmem>>, vector<16x128xbf16>
    %c2_30 = arith.constant 2 : index
    %c0_31 = arith.constant 0 : index
    %c0_32 = arith.constant 0 : index
    %24 = vector.load %arg2[%c2_30, %c0_31, %c0_32] : memref<5x128x128xbf16, #tpu.memory_space<vmem>>, vector<1x128x128xbf16>
    %25 = vector.shape_cast %24 : vector<1x128x128xbf16> to vector<128x128xbf16>
    %cst_33 = arith.constant dense<0.000000e+00> : vector<16x128xf32>
    %26 = tpu.matmul %23, %25, %cst_33 {dimension_numbers = #tpu.dot_dimension_numbers<[1], [0], [0], [1], [0, 0, 1, 1], [], []>} : vector<16x128xbf16>, vector<128x128xbf16>, vector<16x128xf32> -> vector<16x128xf32>
    %27 = arith.addf %22, %26 : vector<16x128xf32>
    %c0_34 = arith.constant 0 : index
    %c0_35 = arith.constant 0 : index
    %28 = vector.load %arg14[%c0_34, %c0_35] : memref<16x128xf32, #tpu.memory_space<vmem>>, vector<16x128xf32>
    tpu.vector_store %arg14[%c0_34, %c0_35], %27 {strides = array<i32>} : memref<16x128xf32, #tpu.memory_space<vmem>>, vector<16x128xf32>,
    %c0_36 = arith.constant 0 : index
    %c0_37 = arith.constant 0 : index
    %29 = vector.load %arg14[%c0_36, %c0_37] : memref<16x128xf32, #tpu.memory_space<vmem>>, vector<16x128xf32>
    %c3 = arith.constant 3 : index
    %c0_38 = arith.constant 0 : index
    %30 = vector.load %arg13[%c3, %c0_38] : memref<20x128xbf16, #tpu.memory_space<vmem>>, vector<16x128xbf16>
    %c3_39 = arith.constant 3 : index
    %c0_40 = arith.constant 0 : index
    %c0_41 = arith.constant 0 : index
    %31 = vector.load %arg2[%c3_39, %c0_40, %c0_41] : memref<5x128x128xbf16, #tpu.memory_space<vmem>>, vector<1x128x128xbf16>
    %32 = vector.shape_cast %31 : vector<1x128x128xbf16> to vector<128x128xbf16>
    %cst_42 = arith.constant dense<0.000000e+00> : vector<16x128xf32>
    %33 = tpu.matmul %30, %32, %cst_42 {dimension_numbers = #tpu.dot_dimension_numbers<[1], [0], [0], [1], [0, 0, 1, 1], [], []>} : vector<16x128xbf16>, vector<128x128xbf16>, vector<16x128xf32> -> vector<16x128xf32>
    %34 = arith.addf %29, %33 : vector<16x128xf32>
    %c0_43 = arith.constant 0 : index
    %c0_44 = arith.constant 0 : index
    %35 = vector.load %arg14[%c0_43, %c0_44] : memref<16x128xf32, #tpu.memory_space<vmem>>, vector<16x128xf32>
    tpu.vector_store %arg14[%c0_43, %c0_44], %34 {strides = array<i32>} : memref<16x128xf32, #tpu.memory_space<vmem>>, vector<16x128xf32>,
    %c0_45 = arith.constant 0 : index
    %c0_46 = arith.constant 0 : index
    %36 = vector.load %arg14[%c0_45, %c0_46] : memref<16x128xf32, #tpu.memory_space<vmem>>, vector<16x128xf32>
    %c4 = arith.constant 4 : index
    %c0_47 = arith.constant 0 : index
    %37 = vector.load %arg13[%c4, %c0_47] : memref<20x128xbf16, #tpu.memory_space<vmem>>, vector<16x128xbf16>
    %c4_48 = arith.constant 4 : index
    %c0_49 = arith.constant 0 : index
    %c0_50 = arith.constant 0 : index
    %38 = vector.load %arg2[%c4_48, %c0_49, %c0_50] : memref<5x128x128xbf16, #tpu.memory_space<vmem>>, vector<1x128x128xbf16>
    %39 = vector.shape_cast %38 : vector<1x128x128xbf16> to vector<128x128xbf16>
    %cst_51 = arith.constant dense<0.000000e+00> : vector<16x128xf32>
    %40 = tpu.matmul %37, %39, %cst_51 {dimension_numbers = #tpu.dot_dimension_numbers<[1], [0], [0], [1], [0, 0, 1, 1], [], []>} : vector<16x128xbf16>, vector<128x128xbf16>, vector<16x128xf32> -> vector<16x128xf32>
    %41 = arith.addf %36, %40 : vector<16x128xf32>
    %c0_52 = arith.constant 0 : index
    %c0_53 = arith.constant 0 : index
    %42 = vector.load %arg14[%c0_52, %c0_53] : memref<16x128xf32, #tpu.memory_space<vmem>>, vector<16x128xf32>
    tpu.vector_store %arg14[%c0_52, %c0_53], %41 {strides = array<i32>} : memref<16x128xf32, #tpu.memory_space<vmem>>, vector<16x128xf32>,
    %c0_54 = arith.constant 0 : index
    %c0_55 = arith.constant 0 : index
    %43 = vector.load %arg14[%c0_54, %c0_55] : memref<16x128xf32, #tpu.memory_space<vmem>>, vector<16x128xf32>
    %c0_56 = arith.constant 0 : index
    %c0_57 = arith.constant 0 : index
    %44 = vector.load %arg3[%c0_56, %c0_57] : memref<1x128xf32, #tpu.memory_space<vmem>>, vector<1x128xf32>
    %45 = vector.broadcast %44 : vector<1x128xf32> to vector<16x128xf32>
    %46 = arith.addf %43, %45 : vector<16x128xf32>
    %47 = math.tanh %46 : vector<16x128xf32>
    %48 = arith.truncf %47 : vector<16x128xf32> to vector<16x128xbf16>
    %c2_58 = arith.constant 2 : index
    %c0_59 = arith.constant 0 : index
    %49 = vector.load %arg13[%c2_58, %c0_59] : memref<20x128xbf16, #tpu.memory_space<vmem>>, vector<16x128xbf16>
    tpu.vector_store %arg13[%c2_58, %c0_59], %48 {strides = array<i32>} : memref<20x128xbf16, #tpu.memory_space<vmem>>, vector<16x128xbf16>,
    %c0_60 = arith.constant 0 : index
    %c0_61 = arith.constant 0 : index
    %50 = vector.load %arg13[%c0_60, %c0_61] : memref<20x128xbf16, #tpu.memory_space<vmem>>, vector<16x128xbf16>
    %c0_62 = arith.constant 0 : index
    %c0_63 = arith.constant 0 : index
    %c0_64 = arith.constant 0 : index
    %51 = vector.load %arg4[%c0_62, %c0_63, %c0_64] : memref<5x128x128xbf16, #tpu.memory_space<vmem>>, vector<1x128x128xbf16>
    %52 = vector.shape_cast %51 : vector<1x128x128xbf16> to vector<128x128xbf16>
    %cst_65 = arith.constant dense<0.000000e+00> : vector<16x128xf32>
    %53 = tpu.matmul %50, %52, %cst_65 {dimension_numbers = #tpu.dot_dimension_numbers<[1], [0], [0], [1], [0, 0, 1, 1], [], []>} : vector<16x128xbf16>, vector<128x128xbf16>, vector<16x128xf32> -> vector<16x128xf32>
    %c0_66 = arith.constant 0 : index
    %c0_67 = arith.constant 0 : index
    %54 = vector.load %arg14[%c0_66, %c0_67] : memref<16x128xf32, #tpu.memory_space<vmem>>, vector<16x128xf32>
    tpu.vector_store %arg14[%c0_66, %c0_67], %53 {strides = array<i32>} : memref<16x128xf32, #tpu.memory_space<vmem>>, vector<16x128xf32>,
    %c0_68 = arith.constant 0 : index
    %c0_69 = arith.constant 0 : index
    %55 = vector.load %arg14[%c0_68, %c0_69] : memref<16x128xf32, #tpu.memory_space<vmem>>, vector<16x128xf32>
    %c1_70 = arith.constant 1 : index
    %c0_71 = arith.constant 0 : index
    %56 = vector.load %arg13[%c1_70, %c0_71] : memref<20x128xbf16, #tpu.memory_space<vmem>>, vector<16x128xbf16>
    %c1_72 = arith.constant 1 : index
    %c0_73 = arith.constant 0 : index
    %c0_74 = arith.constant 0 : index
    %57 = vector.load %arg4[%c1_72, %c0_73, %c0_74] : memref<5x128x128xbf16, #tpu.memory_space<vmem>>, vector<1x128x128xbf16>
    %58 = vector.shape_cast %57 : vector<1x128x128xbf16> to vector<128x128xbf16>
    %cst_75 = arith.constant dense<0.000000e+00> : vector<16x128xf32>
    %59 = tpu.matmul %56, %58, %cst_75 {dimension_numbers = #tpu.dot_dimension_numbers<[1], [0], [0], [1], [0, 0, 1, 1], [], []>} : vector<16x128xbf16>, vector<128x128xbf16>, vector<16x128xf32> -> vector<16x128xf32>
    %60 = arith.addf %55, %59 : vector<16x128xf32>
    %c0_76 = arith.constant 0 : index
    %c0_77 = arith.constant 0 : index
    %61 = vector.load %arg14[%c0_76, %c0_77] : memref<16x128xf32, #tpu.memory_space<vmem>>, vector<16x128xf32>
    tpu.vector_store %arg14[%c0_76, %c0_77], %60 {strides = array<i32>} : memref<16x128xf32, #tpu.memory_space<vmem>>, vector<16x128xf32>,
    %c0_78 = arith.constant 0 : index
    %c0_79 = arith.constant 0 : index
    %62 = vector.load %arg14[%c0_78, %c0_79] : memref<16x128xf32, #tpu.memory_space<vmem>>, vector<16x128xf32>
    %c2_80 = arith.constant 2 : index
    %c0_81 = arith.constant 0 : index
    %63 = vector.load %arg13[%c2_80, %c0_81] : memref<20x128xbf16, #tpu.memory_space<vmem>>, vector<16x128xbf16>
    %c2_82 = arith.constant 2 : index
    %c0_83 = arith.constant 0 : index
    %c0_84 = arith.constant 0 : index
    %64 = vector.load %arg4[%c2_82, %c0_83, %c0_84] : memref<5x128x128xbf16, #tpu.memory_space<vmem>>, vector<1x128x128xbf16>
    %65 = vector.shape_cast %64 : vector<1x128x128xbf16> to vector<128x128xbf16>
    %cst_85 = arith.constant dense<0.000000e+00> : vector<16x128xf32>
    %66 = tpu.matmul %63, %65, %cst_85 {dimension_numbers = #tpu.dot_dimension_numbers<[1], [0], [0], [1], [0, 0, 1, 1], [], []>} : vector<16x128xbf16>, vector<128x128xbf16>, vector<16x128xf32> -> vector<16x128xf32>
    %67 = arith.addf %62, %66 : vector<16x128xf32>
    %c0_86 = arith.constant 0 : index
    %c0_87 = arith.constant 0 : index
    %68 = vector.load %arg14[%c0_86, %c0_87] : memref<16x128xf32, #tpu.memory_space<vmem>>, vector<16x128xf32>
    tpu.vector_store %arg14[%c0_86, %c0_87], %67 {strides = array<i32>} : memref<16x128xf32, #tpu.memory_space<vmem>>, vector<16x128xf32>,
    %c0_88 = arith.constant 0 : index
    %c0_89 = arith.constant 0 : index
    %69 = vector.load %arg14[%c0_88, %c0_89] : memref<16x128xf32, #tpu.memory_space<vmem>>, vector<16x128xf32>
    %c3_90 = arith.constant 3 : index
    %c0_91 = arith.constant 0 : index
    %70 = vector.load %arg13[%c3_90, %c0_91] : memref<20x128xbf16, #tpu.memory_space<vmem>>, vector<16x128xbf16>
    %c3_92 = arith.constant 3 : index
    %c0_93 = arith.constant 0 : index
    %c0_94 = arith.constant 0 : index
    %71 = vector.load %arg4[%c3_92, %c0_93, %c0_94] : memref<5x128x128xbf16, #tpu.memory_space<vmem>>, vector<1x128x128xbf16>
    %72 = vector.shape_cast %71 : vector<1x128x128xbf16> to vector<128x128xbf16>
    %cst_95 = arith.constant dense<0.000000e+00> : vector<16x128xf32>
    %73 = tpu.matmul %70, %72, %cst_95 {dimension_numbers = #tpu.dot_dimension_numbers<[1], [0], [0], [1], [0, 0, 1, 1], [], []>} : vector<16x128xbf16>, vector<128x128xbf16>, vector<16x128xf32> -> vector<16x128xf32>
    %74 = arith.addf %69, %73 : vector<16x128xf32>
    %c0_96 = arith.constant 0 : index
    %c0_97 = arith.constant 0 : index
    %75 = vector.load %arg14[%c0_96, %c0_97] : memref<16x128xf32, #tpu.memory_space<vmem>>, vector<16x128xf32>
    tpu.vector_store %arg14[%c0_96, %c0_97], %74 {strides = array<i32>} : memref<16x128xf32, #tpu.memory_space<vmem>>, vector<16x128xf32>,
    %c0_98 = arith.constant 0 : index
    %c0_99 = arith.constant 0 : index
    %76 = vector.load %arg14[%c0_98, %c0_99] : memref<16x128xf32, #tpu.memory_space<vmem>>, vector<16x128xf32>
    %c4_100 = arith.constant 4 : index
    %c0_101 = arith.constant 0 : index
    %77 = vector.load %arg13[%c4_100, %c0_101] : memref<20x128xbf16, #tpu.memory_space<vmem>>, vector<16x128xbf16>
    %c4_102 = arith.constant 4 : index
    %c0_103 = arith.constant 0 : index
    %c0_104 = arith.constant 0 : index
    %78 = vector.load %arg4[%c4_102, %c0_103, %c0_104] : memref<5x128x128xbf16, #tpu.memory_space<vmem>>, vector<1x128x128xbf16>
    %79 = vector.shape_cast %78 : vector<1x128x128xbf16> to vector<128x128xbf16>
    %cst_105 = arith.constant dense<0.000000e+00> : vector<16x128xf32>
    %80 = tpu.matmul %77, %79, %cst_105 {dimension_numbers = #tpu.dot_dimension_numbers<[1], [0], [0], [1], [0, 0, 1, 1], [], []>} : vector<16x128xbf16>, vector<128x128xbf16>, vector<16x128xf32> -> vector<16x128xf32>
    %81 = arith.addf %76, %80 : vector<16x128xf32>
    %c0_106 = arith.constant 0 : index
    %c0_107 = arith.constant 0 : index
    %82 = vector.load %arg14[%c0_106, %c0_107] : memref<16x128xf32, #tpu.memory_space<vmem>>, vector<16x128xf32>
    tpu.vector_store %arg14[%c0_106, %c0_107], %81 {strides = array<i32>} : memref<16x128xf32, #tpu.memory_space<vmem>>, vector<16x128xf32>,
    %c0_108 = arith.constant 0 : index
    %c0_109 = arith.constant 0 : index
    %83 = vector.load %arg14[%c0_108, %c0_109] : memref<16x128xf32, #tpu.memory_space<vmem>>, vector<16x128xf32>
    %c0_110 = arith.constant 0 : index
    %c0_111 = arith.constant 0 : index
    %84 = vector.load %arg5[%c0_110, %c0_111] : memref<1x128xf32, #tpu.memory_space<vmem>>, vector<1x128xf32>
    %85 = vector.broadcast %84 : vector<1x128xf32> to vector<16x128xf32>
    %86 = arith.addf %83, %85 : vector<16x128xf32>
    %87 = math.tanh %86 : vector<16x128xf32>
    %88 = arith.truncf %87 : vector<16x128xf32> to vector<16x128xbf16>
    %c2_112 = arith.constant 2 : index
    %c0_113 = arith.constant 0 : index
    %89 = vector.load %arg13[%c2_112, %c0_113] : memref<20x128xbf16, #tpu.memory_space<vmem>>, vector<16x128xbf16>
    tpu.vector_store %arg13[%c2_112, %c0_113], %88 {strides = array<i32>} : memref<20x128xbf16, #tpu.memory_space<vmem>>, vector<16x128xbf16>,
    %c0_114 = arith.constant 0 : index
    %c0_115 = arith.constant 0 : index
    %90 = vector.load %arg13[%c0_114, %c0_115] : memref<20x128xbf16, #tpu.memory_space<vmem>>, vector<16x128xbf16>
    %c0_116 = arith.constant 0 : index
    %c0_117 = arith.constant 0 : index
    %c0_118 = arith.constant 0 : index
    %91 = vector.load %arg6[%c0_116, %c0_117, %c0_118] : memref<5x128x128xbf16, #tpu.memory_space<vmem>>, vector<1x128x128xbf16>
    %92 = vector.shape_cast %91 : vector<1x128x128xbf16> to vector<128x128xbf16>
    %cst_119 = arith.constant dense<0.000000e+00> : vector<16x128xf32>
    %93 = tpu.matmul %90, %92, %cst_119 {dimension_numbers = #tpu.dot_dimension_numbers<[1], [0], [0], [1], [0, 0, 1, 1], [], []>} : vector<16x128xbf16>, vector<128x128xbf16>, vector<16x128xf32> -> vector<16x128xf32>
    %c0_120 = arith.constant 0 : index
    %c0_121 = arith.constant 0 : index
    %94 = vector.load %arg14[%c0_120, %c0_121] : memref<16x128xf32, #tpu.memory_space<vmem>>, vector<16x128xf32>
    tpu.vector_store %arg14[%c0_120, %c0_121], %93 {strides = array<i32>} : memref<16x128xf32, #tpu.memory_space<vmem>>, vector<16x128xf32>,
    %c0_122 = arith.constant 0 : index
    %c0_123 = arith.constant 0 : index
    %95 = vector.load %arg14[%c0_122, %c0_123] : memref<16x128xf32, #tpu.memory_space<vmem>>, vector<16x128xf32>
    %c1_124 = arith.constant 1 : index
    %c0_125 = arith.constant 0 : index
    %96 = vector.load %arg13[%c1_124, %c0_125] : memref<20x128xbf16, #tpu.memory_space<vmem>>, vector<16x128xbf16>
    %c1_126 = arith.constant 1 : index
    %c0_127 = arith.constant 0 : index
    %c0_128 = arith.constant 0 : index
    %97 = vector.load %arg6[%c1_126, %c0_127, %c0_128] : memref<5x128x128xbf16, #tpu.memory_space<vmem>>, vector<1x128x128xbf16>
    %98 = vector.shape_cast %97 : vector<1x128x128xbf16> to vector<128x128xbf16>
    %cst_129 = arith.constant dense<0.000000e+00> : vector<16x128xf32>
    %99 = tpu.matmul %96, %98, %cst_129 {dimension_numbers = #tpu.dot_dimension_numbers<[1], [0], [0], [1], [0, 0, 1, 1], [], []>} : vector<16x128xbf16>, vector<128x128xbf16>, vector<16x128xf32> -> vector<16x128xf32>
    %100 = arith.addf %95, %99 : vector<16x128xf32>
    %c0_130 = arith.constant 0 : index
    %c0_131 = arith.constant 0 : index
    %101 = vector.load %arg14[%c0_130, %c0_131] : memref<16x128xf32, #tpu.memory_space<vmem>>, vector<16x128xf32>
    tpu.vector_store %arg14[%c0_130, %c0_131], %100 {strides = array<i32>} : memref<16x128xf32, #tpu.memory_space<vmem>>, vector<16x128xf32>,
    %c0_132 = arith.constant 0 : index
    %c0_133 = arith.constant 0 : index
    %102 = vector.load %arg14[%c0_132, %c0_133] : memref<16x128xf32, #tpu.memory_space<vmem>>, vector<16x128xf32>
    %c2_134 = arith.constant 2 : index
    %c0_135 = arith.constant 0 : index
    %103 = vector.load %arg13[%c2_134, %c0_135] : memref<20x128xbf16, #tpu.memory_space<vmem>>, vector<16x128xbf16>
    %c2_136 = arith.constant 2 : index
    %c0_137 = arith.constant 0 : index
    %c0_138 = arith.constant 0 : index
    %104 = vector.load %arg6[%c2_136, %c0_137, %c0_138] : memref<5x128x128xbf16, #tpu.memory_space<vmem>>, vector<1x128x128xbf16>
    %105 = vector.shape_cast %104 : vector<1x128x128xbf16> to vector<128x128xbf16>
    %cst_139 = arith.constant dense<0.000000e+00> : vector<16x128xf32>
    %106 = tpu.matmul %103, %105, %cst_139 {dimension_numbers = #tpu.dot_dimension_numbers<[1], [0], [0], [1], [0, 0, 1, 1], [], []>} : vector<16x128xbf16>, vector<128x128xbf16>, vector<16x128xf32> -> vector<16x128xf32>
    %107 = arith.addf %102, %106 : vector<16x128xf32>
    %c0_140 = arith.constant 0 : index
    %c0_141 = arith.constant 0 : index
    %108 = vector.load %arg14[%c0_140, %c0_141] : memref<16x128xf32, #tpu.memory_space<vmem>>, vector<16x128xf32>
    tpu.vector_store %arg14[%c0_140, %c0_141], %107 {strides = array<i32>} : memref<16x128xf32, #tpu.memory_space<vmem>>, vector<16x128xf32>,
    %c0_142 = arith.constant 0 : index
    %c0_143 = arith.constant 0 : index
    %109 = vector.load %arg14[%c0_142, %c0_143] : memref<16x128xf32, #tpu.memory_space<vmem>>, vector<16x128xf32>
    %c3_144 = arith.constant 3 : index
    %c0_145 = arith.constant 0 : index
    %110 = vector.load %arg13[%c3_144, %c0_145] : memref<20x128xbf16, #tpu.memory_space<vmem>>, vector<16x128xbf16>
    %c3_146 = arith.constant 3 : index
    %c0_147 = arith.constant 0 : index
    %c0_148 = arith.constant 0 : index
    %111 = vector.load %arg6[%c3_146, %c0_147, %c0_148] : memref<5x128x128xbf16, #tpu.memory_space<vmem>>, vector<1x128x128xbf16>
    %112 = vector.shape_cast %111 : vector<1x128x128xbf16> to vector<128x128xbf16>
    %cst_149 = arith.constant dense<0.000000e+00> : vector<16x128xf32>
    %113 = tpu.matmul %110, %112, %cst_149 {dimension_numbers = #tpu.dot_dimension_numbers<[1], [0], [0], [1], [0, 0, 1, 1], [], []>} : vector<16x128xbf16>, vector<128x128xbf16>, vector<16x128xf32> -> vector<16x128xf32>
    %114 = arith.addf %109, %113 : vector<16x128xf32>
    %c0_150 = arith.constant 0 : index
    %c0_151 = arith.constant 0 : index
    %115 = vector.load %arg14[%c0_150, %c0_151] : memref<16x128xf32, #tpu.memory_space<vmem>>, vector<16x128xf32>
    tpu.vector_store %arg14[%c0_150, %c0_151], %114 {strides = array<i32>} : memref<16x128xf32, #tpu.memory_space<vmem>>, vector<16x128xf32>,
    %c0_152 = arith.constant 0 : index
    %c0_153 = arith.constant 0 : index
    %116 = vector.load %arg14[%c0_152, %c0_153] : memref<16x128xf32, #tpu.memory_space<vmem>>, vector<16x128xf32>
    %c4_154 = arith.constant 4 : index
    %c0_155 = arith.constant 0 : index
    %117 = vector.load %arg13[%c4_154, %c0_155] : memref<20x128xbf16, #tpu.memory_space<vmem>>, vector<16x128xbf16>
    %c4_156 = arith.constant 4 : index
    %c0_157 = arith.constant 0 : index
    %c0_158 = arith.constant 0 : index
    %118 = vector.load %arg6[%c4_156, %c0_157, %c0_158] : memref<5x128x128xbf16, #tpu.memory_space<vmem>>, vector<1x128x128xbf16>
    %119 = vector.shape_cast %118 : vector<1x128x128xbf16> to vector<128x128xbf16>
    %cst_159 = arith.constant dense<0.000000e+00> : vector<16x128xf32>
    %120 = tpu.matmul %117, %119, %cst_159 {dimension_numbers = #tpu.dot_dimension_numbers<[1], [0], [0], [1], [0, 0, 1, 1], [], []>} : vector<16x128xbf16>, vector<128x128xbf16>, vector<16x128xf32> -> vector<16x128xf32>
    %121 = arith.addf %116, %120 : vector<16x128xf32>
    %c0_160 = arith.constant 0 : index
    %c0_161 = arith.constant 0 : index
    %122 = vector.load %arg14[%c0_160, %c0_161] : memref<16x128xf32, #tpu.memory_space<vmem>>, vector<16x128xf32>
    tpu.vector_store %arg14[%c0_160, %c0_161], %121 {strides = array<i32>} : memref<16x128xf32, #tpu.memory_space<vmem>>, vector<16x128xf32>,
    %c0_162 = arith.constant 0 : index
    %c0_163 = arith.constant 0 : index
    %123 = vector.load %arg14[%c0_162, %c0_163] : memref<16x128xf32, #tpu.memory_space<vmem>>, vector<16x128xf32>
    %c0_164 = arith.constant 0 : index
    %c0_165 = arith.constant 0 : index
    %124 = vector.load %arg7[%c0_164, %c0_165] : memref<1x128xf32, #tpu.memory_space<vmem>>, vector<1x128xf32>
    %125 = vector.broadcast %124 : vector<1x128xf32> to vector<16x128xf32>
    %126 = arith.addf %123, %125 : vector<16x128xf32>
    %127 = math.tanh %126 : vector<16x128xf32>
    %128 = arith.truncf %127 : vector<16x128xf32> to vector<16x128xbf16>
    %c2_166 = arith.constant 2 : index
    %c0_167 = arith.constant 0 : index
    %129 = vector.load %arg13[%c2_166, %c0_167] : memref<20x128xbf16, #tpu.memory_space<vmem>>, vector<16x128xbf16>
    tpu.vector_store %arg13[%c2_166, %c0_167], %128 {strides = array<i32>} : memref<20x128xbf16, #tpu.memory_space<vmem>>, vector<16x128xbf16>,
    %c0_168 = arith.constant 0 : index
    %c0_169 = arith.constant 0 : index
    %130 = vector.load %arg13[%c0_168, %c0_169] : memref<20x128xbf16, #tpu.memory_space<vmem>>, vector<16x128xbf16>
    %c0_170 = arith.constant 0 : index
    %c0_171 = arith.constant 0 : index
    %c0_172 = arith.constant 0 : index
    %131 = vector.load %arg8[%c0_170, %c0_171, %c0_172] : memref<5x128x128xbf16, #tpu.memory_space<vmem>>, vector<1x128x128xbf16>
    %132 = vector.shape_cast %131 : vector<1x128x128xbf16> to vector<128x128xbf16>
    %cst_173 = arith.constant dense<0.000000e+00> : vector<16x128xf32>
    %133 = tpu.matmul %130, %132, %cst_173 {dimension_numbers = #tpu.dot_dimension_numbers<[1], [0], [0], [1], [0, 0, 1, 1], [], []>} : vector<16x128xbf16>, vector<128x128xbf16>, vector<16x128xf32> -> vector<16x128xf32>
    %c0_174 = arith.constant 0 : index
    %c0_175 = arith.constant 0 : index
    %134 = vector.load %arg14[%c0_174, %c0_175] : memref<16x128xf32, #tpu.memory_space<vmem>>, vector<16x128xf32>
    tpu.vector_store %arg14[%c0_174, %c0_175], %133 {strides = array<i32>} : memref<16x128xf32, #tpu.memory_space<vmem>>, vector<16x128xf32>,
    %c0_176 = arith.constant 0 : index
    %c0_177 = arith.constant 0 : index
    %135 = vector.load %arg14[%c0_176, %c0_177] : memref<16x128xf32, #tpu.memory_space<vmem>>, vector<16x128xf32>
    %c1_178 = arith.constant 1 : index
    %c0_179 = arith.constant 0 : index
    %136 = vector.load %arg13[%c1_178, %c0_179] : memref<20x128xbf16, #tpu.memory_space<vmem>>, vector<16x128xbf16>
    %c1_180 = arith.constant 1 : index
    %c0_181 = arith.constant 0 : index
    %c0_182 = arith.constant 0 : index
    %137 = vector.load %arg8[%c1_180, %c0_181, %c0_182] : memref<5x128x128xbf16, #tpu.memory_space<vmem>>, vector<1x128x128xbf16>
    %138 = vector.shape_cast %137 : vector<1x128x128xbf16> to vector<128x128xbf16>
    %cst_183 = arith.constant dense<0.000000e+00> : vector<16x128xf32>
    %139 = tpu.matmul %136, %138, %cst_183 {dimension_numbers = #tpu.dot_dimension_numbers<[1], [0], [0], [1], [0, 0, 1, 1], [], []>} : vector<16x128xbf16>, vector<128x128xbf16>, vector<16x128xf32> -> vector<16x128xf32>
    %140 = arith.addf %135, %139 : vector<16x128xf32>
    %c0_184 = arith.constant 0 : index
    %c0_185 = arith.constant 0 : index
    %141 = vector.load %arg14[%c0_184, %c0_185] : memref<16x128xf32, #tpu.memory_space<vmem>>, vector<16x128xf32>
    tpu.vector_store %arg14[%c0_184, %c0_185], %140 {strides = array<i32>} : memref<16x128xf32, #tpu.memory_space<vmem>>, vector<16x128xf32>,
    %c0_186 = arith.constant 0 : index
    %c0_187 = arith.constant 0 : index
    %142 = vector.load %arg14[%c0_186, %c0_187] : memref<16x128xf32, #tpu.memory_space<vmem>>, vector<16x128xf32>
    %c2_188 = arith.constant 2 : index
    %c0_189 = arith.constant 0 : index
    %143 = vector.load %arg13[%c2_188, %c0_189] : memref<20x128xbf16, #tpu.memory_space<vmem>>, vector<16x128xbf16>
    %c2_190 = arith.constant 2 : index
    %c0_191 = arith.constant 0 : index
    %c0_192 = arith.constant 0 : index
    %144 = vector.load %arg8[%c2_190, %c0_191, %c0_192] : memref<5x128x128xbf16, #tpu.memory_space<vmem>>, vector<1x128x128xbf16>
    %145 = vector.shape_cast %144 : vector<1x128x128xbf16> to vector<128x128xbf16>
    %cst_193 = arith.constant dense<0.000000e+00> : vector<16x128xf32>
    %146 = tpu.matmul %143, %145, %cst_193 {dimension_numbers = #tpu.dot_dimension_numbers<[1], [0], [0], [1], [0, 0, 1, 1], [], []>} : vector<16x128xbf16>, vector<128x128xbf16>, vector<16x128xf32> -> vector<16x128xf32>
    %147 = arith.addf %142, %146 : vector<16x128xf32>
    %c0_194 = arith.constant 0 : index
    %c0_195 = arith.constant 0 : index
    %148 = vector.load %arg14[%c0_194, %c0_195] : memref<16x128xf32, #tpu.memory_space<vmem>>, vector<16x128xf32>
    tpu.vector_store %arg14[%c0_194, %c0_195], %147 {strides = array<i32>} : memref<16x128xf32, #tpu.memory_space<vmem>>, vector<16x128xf32>,
    %c0_196 = arith.constant 0 : index
    %c0_197 = arith.constant 0 : index
    %149 = vector.load %arg14[%c0_196, %c0_197] : memref<16x128xf32, #tpu.memory_space<vmem>>, vector<16x128xf32>
    %c3_198 = arith.constant 3 : index
    %c0_199 = arith.constant 0 : index
    %150 = vector.load %arg13[%c3_198, %c0_199] : memref<20x128xbf16, #tpu.memory_space<vmem>>, vector<16x128xbf16>
    %c3_200 = arith.constant 3 : index
    %c0_201 = arith.constant 0 : index
    %c0_202 = arith.constant 0 : index
    %151 = vector.load %arg8[%c3_200, %c0_201, %c0_202] : memref<5x128x128xbf16, #tpu.memory_space<vmem>>, vector<1x128x128xbf16>
    %152 = vector.shape_cast %151 : vector<1x128x128xbf16> to vector<128x128xbf16>
    %cst_203 = arith.constant dense<0.000000e+00> : vector<16x128xf32>
    %153 = tpu.matmul %150, %152, %cst_203 {dimension_numbers = #tpu.dot_dimension_numbers<[1], [0], [0], [1], [0, 0, 1, 1], [], []>} : vector<16x128xbf16>, vector<128x128xbf16>, vector<16x128xf32> -> vector<16x128xf32>
    %154 = arith.addf %149, %153 : vector<16x128xf32>
    %c0_204 = arith.constant 0 : index
    %c0_205 = arith.constant 0 : index
    %155 = vector.load %arg14[%c0_204, %c0_205] : memref<16x128xf32, #tpu.memory_space<vmem>>, vector<16x128xf32>
    tpu.vector_store %arg14[%c0_204, %c0_205], %154 {strides = array<i32>} : memref<16x128xf32, #tpu.memory_space<vmem>>, vector<16x128xf32>,
    %c0_206 = arith.constant 0 : index
    %c0_207 = arith.constant 0 : index
    %156 = vector.load %arg14[%c0_206, %c0_207] : memref<16x128xf32, #tpu.memory_space<vmem>>, vector<16x128xf32>
    %c4_208 = arith.constant 4 : index
    %c0_209 = arith.constant 0 : index
    %157 = vector.load %arg13[%c4_208, %c0_209] : memref<20x128xbf16, #tpu.memory_space<vmem>>, vector<16x128xbf16>
    %c4_210 = arith.constant 4 : index
    %c0_211 = arith.constant 0 : index
    %c0_212 = arith.constant 0 : index
    %158 = vector.load %arg8[%c4_210, %c0_211, %c0_212] : memref<5x128x128xbf16, #tpu.memory_space<vmem>>, vector<1x128x128xbf16>
    %159 = vector.shape_cast %158 : vector<1x128x128xbf16> to vector<128x128xbf16>
    %cst_213 = arith.constant dense<0.000000e+00> : vector<16x128xf32>
    %160 = tpu.matmul %157, %159, %cst_213 {dimension_numbers = #tpu.dot_dimension_numbers<[1], [0], [0], [1], [0, 0, 1, 1], [], []>} : vector<16x128xbf16>, vector<128x128xbf16>, vector<16x128xf32> -> vector<16x128xf32>
    %161 = arith.addf %156, %160 : vector<16x128xf32>
    %c0_214 = arith.constant 0 : index
    %c0_215 = arith.constant 0 : index
    %162 = vector.load %arg14[%c0_214, %c0_215] : memref<16x128xf32, #tpu.memory_space<vmem>>, vector<16x128xf32>
    tpu.vector_store %arg14[%c0_214, %c0_215], %161 {strides = array<i32>} : memref<16x128xf32, #tpu.memory_space<vmem>>, vector<16x128xf32>,
    %c0_216 = arith.constant 0 : index
    %c0_217 = arith.constant 0 : index
    %163 = vector.load %arg14[%c0_216, %c0_217] : memref<16x128xf32, #tpu.memory_space<vmem>>, vector<16x128xf32>
    %c0_218 = arith.constant 0 : index
    %c0_219 = arith.constant 0 : index
    %164 = vector.load %arg9[%c0_218, %c0_219] : memref<1x128xf32, #tpu.memory_space<vmem>>, vector<1x128xf32>
    %165 = vector.broadcast %164 : vector<1x128xf32> to vector<16x128xf32>
    %166 = arith.addf %163, %165 : vector<16x128xf32>
    %167 = math.tanh %166 : vector<16x128xf32>
    %168 = arith.truncf %167 : vector<16x128xf32> to vector<16x128xbf16>
    %c2_220 = arith.constant 2 : index
    %c0_221 = arith.constant 0 : index
    %169 = vector.load %arg13[%c2_220, %c0_221] : memref<20x128xbf16, #tpu.memory_space<vmem>>, vector<16x128xbf16>
    tpu.vector_store %arg13[%c2_220, %c0_221], %168 {strides = array<i32>} : memref<20x128xbf16, #tpu.memory_space<vmem>>, vector<16x128xbf16>,
    %c0_222 = arith.constant 0 : index
    %c0_223 = arith.constant 0 : index
    %170 = vector.load %arg13[%c0_222, %c0_223] : memref<20x128xbf16, #tpu.memory_space<vmem>>, vector<16x128xbf16>
    %c0_224 = arith.constant 0 : index
    %c0_225 = arith.constant 0 : index
    %c0_226 = arith.constant 0 : index
    %171 = vector.load %arg10[%c0_224, %c0_225, %c0_226] : memref<5x128x128xbf16, #tpu.memory_space<vmem>>, vector<1x128x128xbf16>
    %172 = vector.shape_cast %171 : vector<1x128x128xbf16> to vector<128x128xbf16>
    %cst_227 = arith.constant dense<0.000000e+00> : vector<16x128xf32>
    %173 = tpu.matmul %170, %172, %cst_227 {dimension_numbers = #tpu.dot_dimension_numbers<[1], [0], [0], [1], [0, 0, 1, 1], [], []>} : vector<16x128xbf16>, vector<128x128xbf16>, vector<16x128xf32> -> vector<16x128xf32>
    %c0_228 = arith.constant 0 : index
    %c0_229 = arith.constant 0 : index
    %174 = vector.load %arg14[%c0_228, %c0_229] : memref<16x128xf32, #tpu.memory_space<vmem>>, vector<16x128xf32>
    tpu.vector_store %arg14[%c0_228, %c0_229], %173 {strides = array<i32>} : memref<16x128xf32, #tpu.memory_space<vmem>>, vector<16x128xf32>,
    %c0_230 = arith.constant 0 : index
    %c0_231 = arith.constant 0 : index
    %175 = vector.load %arg14[%c0_230, %c0_231] : memref<16x128xf32, #tpu.memory_space<vmem>>, vector<16x128xf32>
    %c1_232 = arith.constant 1 : index
    %c0_233 = arith.constant 0 : index
    %176 = vector.load %arg13[%c1_232, %c0_233] : memref<20x128xbf16, #tpu.memory_space<vmem>>, vector<16x128xbf16>
    %c1_234 = arith.constant 1 : index
    %c0_235 = arith.constant 0 : index
    %c0_236 = arith.constant 0 : index
    %177 = vector.load %arg10[%c1_234, %c0_235, %c0_236] : memref<5x128x128xbf16, #tpu.memory_space<vmem>>, vector<1x128x128xbf16>
    %178 = vector.shape_cast %177 : vector<1x128x128xbf16> to vector<128x128xbf16>
    %cst_237 = arith.constant dense<0.000000e+00> : vector<16x128xf32>
    %179 = tpu.matmul %176, %178, %cst_237 {dimension_numbers = #tpu.dot_dimension_numbers<[1], [0], [0], [1], [0, 0, 1, 1], [], []>} : vector<16x128xbf16>, vector<128x128xbf16>, vector<16x128xf32> -> vector<16x128xf32>
    %180 = arith.addf %175, %179 : vector<16x128xf32>
    %c0_238 = arith.constant 0 : index
    %c0_239 = arith.constant 0 : index
    %181 = vector.load %arg14[%c0_238, %c0_239] : memref<16x128xf32, #tpu.memory_space<vmem>>, vector<16x128xf32>
    tpu.vector_store %arg14[%c0_238, %c0_239], %180 {strides = array<i32>} : memref<16x128xf32, #tpu.memory_space<vmem>>, vector<16x128xf32>,
    %c0_240 = arith.constant 0 : index
    %c0_241 = arith.constant 0 : index
    %182 = vector.load %arg14[%c0_240, %c0_241] : memref<16x128xf32, #tpu.memory_space<vmem>>, vector<16x128xf32>
    %c2_242 = arith.constant 2 : index
    %c0_243 = arith.constant 0 : index
    %183 = vector.load %arg13[%c2_242, %c0_243] : memref<20x128xbf16, #tpu.memory_space<vmem>>, vector<16x128xbf16>
    %c2_244 = arith.constant 2 : index
    %c0_245 = arith.constant 0 : index
    %c0_246 = arith.constant 0 : index
    %184 = vector.load %arg10[%c2_244, %c0_245, %c0_246] : memref<5x128x128xbf16, #tpu.memory_space<vmem>>, vector<1x128x128xbf16>
    %185 = vector.shape_cast %184 : vector<1x128x128xbf16> to vector<128x128xbf16>
    %cst_247 = arith.constant dense<0.000000e+00> : vector<16x128xf32>
    %186 = tpu.matmul %183, %185, %cst_247 {dimension_numbers = #tpu.dot_dimension_numbers<[1], [0], [0], [1], [0, 0, 1, 1], [], []>} : vector<16x128xbf16>, vector<128x128xbf16>, vector<16x128xf32> -> vector<16x128xf32>
    %187 = arith.addf %182, %186 : vector<16x128xf32>
    %c0_248 = arith.constant 0 : index
    %c0_249 = arith.constant 0 : index
    %188 = vector.load %arg14[%c0_248, %c0_249] : memref<16x128xf32, #tpu.memory_space<vmem>>, vector<16x128xf32>
    tpu.vector_store %arg14[%c0_248, %c0_249], %187 {strides = array<i32>} : memref<16x128xf32, #tpu.memory_space<vmem>>, vector<16x128xf32>,
    %c0_250 = arith.constant 0 : index
    %c0_251 = arith.constant 0 : index
    %189 = vector.load %arg14[%c0_250, %c0_251] : memref<16x128xf32, #tpu.memory_space<vmem>>, vector<16x128xf32>
    %c3_252 = arith.constant 3 : index
    %c0_253 = arith.constant 0 : index
    %190 = vector.load %arg13[%c3_252, %c0_253] : memref<20x128xbf16, #tpu.memory_space<vmem>>, vector<16x128xbf16>
    %c3_254 = arith.constant 3 : index
    %c0_255 = arith.constant 0 : index
    %c0_256 = arith.constant 0 : index
    %191 = vector.load %arg10[%c3_254, %c0_255, %c0_256] : memref<5x128x128xbf16, #tpu.memory_space<vmem>>, vector<1x128x128xbf16>
    %192 = vector.shape_cast %191 : vector<1x128x128xbf16> to vector<128x128xbf16>
    %cst_257 = arith.constant dense<0.000000e+00> : vector<16x128xf32>
    %193 = tpu.matmul %190, %192, %cst_257 {dimension_numbers = #tpu.dot_dimension_numbers<[1], [0], [0], [1], [0, 0, 1, 1], [], []>} : vector<16x128xbf16>, vector<128x128xbf16>, vector<16x128xf32> -> vector<16x128xf32>
    %194 = arith.addf %189, %193 : vector<16x128xf32>
    %c0_258 = arith.constant 0 : index
    %c0_259 = arith.constant 0 : index
    %195 = vector.load %arg14[%c0_258, %c0_259] : memref<16x128xf32, #tpu.memory_space<vmem>>, vector<16x128xf32>
    tpu.vector_store %arg14[%c0_258, %c0_259], %194 {strides = array<i32>} : memref<16x128xf32, #tpu.memory_space<vmem>>, vector<16x128xf32>,
    %c0_260 = arith.constant 0 : index
    %c0_261 = arith.constant 0 : index
    %196 = vector.load %arg14[%c0_260, %c0_261] : memref<16x128xf32, #tpu.memory_space<vmem>>, vector<16x128xf32>
    %c4_262 = arith.constant 4 : index
    %c0_263 = arith.constant 0 : index
    %197 = vector.load %arg13[%c4_262, %c0_263] : memref<20x128xbf16, #tpu.memory_space<vmem>>, vector<16x128xbf16>
    %c4_264 = arith.constant 4 : index
    %c0_265 = arith.constant 0 : index
    %c0_266 = arith.constant 0 : index
    %198 = vector.load %arg10[%c4_264, %c0_265, %c0_266] : memref<5x128x128xbf16, #tpu.memory_space<vmem>>, vector<1x128x128xbf16>
    %199 = vector.shape_cast %198 : vector<1x128x128xbf16> to vector<128x128xbf16>
    %cst_267 = arith.constant dense<0.000000e+00> : vector<16x128xf32>
    %200 = tpu.matmul %197, %199, %cst_267 {dimension_numbers = #tpu.dot_dimension_numbers<[1], [0], [0], [1], [0, 0, 1, 1], [], []>} : vector<16x128xbf16>, vector<128x128xbf16>, vector<16x128xf32> -> vector<16x128xf32>
    %201 = arith.addf %196, %200 : vector<16x128xf32>
    %c0_268 = arith.constant 0 : index
    %c0_269 = arith.constant 0 : index
    %202 = vector.load %arg14[%c0_268, %c0_269] : memref<16x128xf32, #tpu.memory_space<vmem>>, vector<16x128xf32>
    tpu.vector_store %arg14[%c0_268, %c0_269], %201 {strides = array<i32>} : memref<16x128xf32, #tpu.memory_space<vmem>>, vector<16x128xf32>,
    %c0_270 = arith.constant 0 : index
    %c0_271 = arith.constant 0 : index
    %203 = vector.load %arg14[%c0_270, %c0_271] : memref<16x128xf32, #tpu.memory_space<vmem>>, vector<16x128xf32>
    %c0_272 = arith.constant 0 : index
    %c0_273 = arith.constant 0 : index
    %204 = vector.load %arg11[%c0_272, %c0_273] : memref<1x128xf32, #tpu.memory_space<vmem>>, vector<1x128xf32>
    %205 = vector.broadcast %204 : vector<1x128xf32> to vector<16x128xf32>
    %206 = arith.addf %203, %205 : vector<16x128xf32>
    %c0_274 = arith.constant 0 : index
    %c0_275 = arith.constant 0 : index
    %c0_276 = arith.constant 0 : index
    %207 = vector.load %arg12[%c0_274, %c0_275, %c0_276] : memref<1x16x128xf32, #tpu.memory_space<vmem>>, vector<1x16x128xf32>
    %208 = vector.shape_cast %207 : vector<1x16x128xf32> to vector<16x128xf32>
    %209 = vector.shape_cast %206 : vector<16x128xf32> to vector<1x16x128xf32>
    tpu.vector_store %arg12[%c0_274, %c0_275, %c0_276], %209 {strides = array<i32>} : memref<1x16x128xf32, #tpu.memory_space<vmem>>, vector<1x16x128xf32>,
    return
  }
  func.func @transform_0(%arg0: i32) -> (i32, i32, i32) {
    %c0_i32 = arith.constant 0 : i32
    %c0_i32_0 = arith.constant 0 : i32
    %c0_i32_1 = arith.constant 0 : i32
    return %arg0, %c0_i32, %c0_i32_0 : i32, i32, i32
  }
  func.func @transform_1(%arg0: i32) -> (i32, i32, i32) {
    %c0_i32 = arith.constant 0 : i32
    %c0_i32_0 = arith.constant 0 : i32
    %c0_i32_1 = arith.constant 0 : i32
    %c0_i32_2 = arith.constant 0 : i32
    return %c0_i32, %c0_i32_0, %c0_i32_1 : i32, i32, i32
  }
  func.func @transform_2(%arg0: i32) -> (i32, i32) {
    %c0_i32 = arith.constant 0 : i32
    %c0_i32_0 = arith.constant 0 : i32
    %c0_i32_1 = arith.constant 0 : i32
    return %c0_i32, %c0_i32_0 : i32, i32
  }
  func.func @transform_3(%arg0: i32) -> (i32, i32, i32) {
    %c0_i32 = arith.constant 0 : i32
    %c0_i32_0 = arith.constant 0 : i32
    %c0_i32_1 = arith.constant 0 : i32
    %c0_i32_2 = arith.constant 0 : i32
    return %c0_i32, %c0_i32_0, %c0_i32_1 : i32, i32, i32
  }
  func.func @transform_4(%arg0: i32) -> (i32, i32) {
    %c0_i32 = arith.constant 0 : i32
    %c0_i32_0 = arith.constant 0 : i32
    %c0_i32_1 = arith.constant 0 : i32
    return %c0_i32, %c0_i32_0 : i32, i32
  }
  func.func @transform_5(%arg0: i32) -> (i32, i32, i32) {
    %c0_i32 = arith.constant 0 : i32
    %c0_i32_0 = arith.constant 0 : i32
    %c0_i32_1 = arith.constant 0 : i32
    %c0_i32_2 = arith.constant 0 : i32
    return %c0_i32, %c0_i32_0, %c0_i32_1 : i32, i32, i32
  }
  func.func @transform_6(%arg0: i32) -> (i32, i32) {
    %c0_i32 = arith.constant 0 : i32
    %c0_i32_0 = arith.constant 0 : i32
    %c0_i32_1 = arith.constant 0 : i32
    return %c0_i32, %c0_i32_0 : i32, i32
  }
  func.func @transform_7(%arg0: i32) -> (i32, i32, i32) {
    %c0_i32 = arith.constant 0 : i32
    %c0_i32_0 = arith.constant 0 : i32
    %c0_i32_1 = arith.constant 0 : i32
    %c0_i32_2 = arith.constant 0 : i32
    return %c0_i32, %c0_i32_0, %c0_i32_1 : i32, i32, i32
  }
  func.func @transform_8(%arg0: i32) -> (i32, i32) {
    %c0_i32 = arith.constant 0 : i32
    %c0_i32_0 = arith.constant 0 : i32
    %c0_i32_1 = arith.constant 0 : i32
    return %c0_i32, %c0_i32_0 : i32, i32
  }
  func.func @transform_9(%arg0: i32) -> (i32, i32, i32) {
    %c0_i32 = arith.constant 0 : i32
    %c0_i32_0 = arith.constant 0 : i32
    %c0_i32_1 = arith.constant 0 : i32
    %c0_i32_2 = arith.constant 0 : i32
    return %c0_i32, %c0_i32_0, %c0_i32_1 : i32, i32, i32
  }
  func.func @transform_10(%arg0: i32) -> (i32, i32) {
    %c0_i32 = arith.constant 0 : i32
    %c0_i32_0 = arith.constant 0 : i32
    %c0_i32_1 = arith.constant 0 : i32
    return %c0_i32, %c0_i32_0 : i32, i32
  }
  func.func @transform_11(%arg0: i32) -> (i32, i32, i32) {
    %c0_i32 = arith.constant 0 : i32
    %c0_i32_0 = arith.constant 0 : i32
    %c0_i32_1 = arith.constant 0 : i32
    return %arg0, %c0_i32, %c0_i32_0 : i32, i32, i32
  }
}

</mosaic_0001>

<bundles_post_ra>
// kernel: tpu_custom_call.1
= control target key start
LH: loop header
LB: loop body
LE: loop exit
PB: predicated region body
PF: predicated region fallthrough
CT: control target
= control target key end

     0   :  { %s6366_s0 = inlined_call_operand.hbm [shape: f32[2,16,16], index: 0, kind: input, shape index: {}]   ;;  %s6367_s1 = inlined_call_operand.hbm [shape: bf16[5,128,128], index: 1, kind: input, shape index: {}]   ;;  %s6368_s2 = inlined_call_operand.vmem [shape: f32[1,128], index: 2, kind: input, shape index: {}]   ;;  %s6369_s3 = inlined_call_operand.hbm [shape: bf16[5,128,128], index: 3, kind: input, shape index: {}]   ;;  %s6370_s4 = inlined_call_operand.vmem [shape: f32[1,128], index: 4, kind: input, shape index: {}]   ;;  %s6371_s5 = inlined_call_operand.hbm [shape: bf16[5,128,128], index: 5, kind: input, shape index: {}]   ;;  %s6372_s6 = inlined_call_operand.vmem [shape: f32[1,128], index: 6, kind: input, shape index: {}]   ;;  %s6373_s7 = inlined_call_operand.hbm [shape: bf16[5,128,128], index: 7, kind: input, shape index: {}]   ;;  %s6374_s8 = inlined_call_operand.vmem [shape: f32[1,128], index: 8, kind: input, shape index: {}]   ;;  %s6375_s9 = inlined_call_operand.hbm [shape: bf16[5,128,128], index: 9, kind: input, shape index: {}]   ;;  %s6376_s10 = inlined_call_operand.vmem [shape: f32[1,128], index: 10, kind: input, shape index: {}]   ;;  %s6377_s11 = inlined_call_operand.hbm [shape: f32[2,16,128], index: 11, kind: output, shape index: {}]  }
   0x1   :  { %6382 = sst [smem:[#allocation21_spill]] %s6367_s1 }
   0x2   :  { %6383 = sst [smem:[#allocation22_spill]] %s6374_s8 }
   0x3   :  { %6384 = sst [smem:[#allocation23_spill]] %s6376_s10 }
   0x4   :  { %6385 = sst [smem:[#allocation24_spill]] %s6377_s11 }
   0x5   :  { %16 = vsyncpa [#allocation5], 0 }
   0x6   :  { %18 = vsyncpa [#allocation5 + $0x1], 0 }
   0x7   :  { %19 = vsyncpa [#allocation8], 0 }
   0x8   :  { %20 = vsyncpa [#allocation11], 0 }
   0x9   :  { %21 = vsyncpa [#allocation14], 0 }
   0xa   :  { %22 = vsyncpa [#allocation6], 0 }
   0xb   :  { %24 = vsyncpa [#allocation6 + $0x1], 0  ;;  %s5728_s17 = smov 0   ;;  %s5730_s18 = smov 0  }
   0xc   :  { %s5732_s19 = smov 0   ;;  %s5734_s20 = smov 0  }
   0xd LB: > { %s5652_s21 = smov [#allocation7]   ;;  %s5749_s23 = sadd.s32 4294967295, %s5650_s20   ;;  %s5650_s20 = sphi %s5734_s20, %s6413_s20   ;;  %s5646_s19 = sphi %s5732_s19, %s6412_s19   ;;  %s5642_s18 = sphi %s5730_s18, %s6411_s18   ;;  %s5638_s17 = sphi %s5728_s17, %s6410_s17  }
   0xe   : > { %s309_s22 = sshll.u32 %s5652_s21, 4  ;;  %p4015_p0 = scmp.ge.s32.totalorder %s5650_s20, 1  ;;  %s5754_s22 = int_to_ptr.vmem [resolvable:$true] %s309_s22 }
   0xf   : > { %p6379_p1 = scmp.eq.s32.totalorder %s5749_s23, 0  ;;  %p297_p2 = scmp.lt.s32.totalorder %s5650_s20, 3 }
  0x10   : > { %s5653_s25 = smov [#allocation10]   ;;  %s5654_s28 = smov [#allocation9]  }
  0x11   : > { %p5756_p3 = pnand %p4015_p0, %p297_p2  ;;  %s341_s26 = sshll.u32 %s5653_s25, 4  ;;  %s5769_s26 = int_to_ptr.vmem [resolvable:$true] %s341_s26 }
  0x12   : > { %s325_s29 = sshll.u32 %s5654_s28, 4  ;;  %s6388_s1 = sld [smem:[#allocation21_spill]]  ;;  %s5771_s29 = int_to_ptr.vmem [resolvable:$true] %s325_s29 }
  0x13   : > { %s6386_s24 = scalar_select %p5756_p3, 1, 0 }
  0x14   : > { %p5059_p5 = pneg %p5756_p3 }
  0x16   : > { %p5765_p6 = pnand %p5059_p5, %p6379_p1 }
  0x18   : > { %s5402_s13 = scalar_lea.hbm %s6388_s1, 5120  ;;  %p5781_p8 = pneg %p5765_p6 }
  0x19   : > { %p5403_p7 = scmp.ne.s32.totalorder %s6388_s1, %s5402_s13  ;;  %p5409_p11 = scmp.lt.u32.totalorder %s5402_s13, %s6388_s1 }
  0x1b   : > { %p5405_p9 = pnand %p5781_p8, %p5403_p7 }
  0x1d   : > { %p5406_p10 = pneg %p5405_p9 }
  0x1f   : > { %p5411_p12 = pnand %p5409_p11, %p5406_p10 }
  0x21   : > { %5414 = shalt.err (!%p5411_p12)
}
  0x22   : > { %s5415_s28 = scalar_lea.vmem %s5754_s22, 5120  ;;  %p5423_p5 = scmp.lt.s32.totalorder %s5754_s22, %s5754_s22 }
  0x23   : > { %p5416_p13 = scmp.ne.s32.totalorder %s5754_s22, %s5415_s28  ;;  %p5424_p4 = scmp.lt.s32.totalorder %s5415_s28, %s5415_s28 }
  0x25   : > { %p5418_p0 = pnand %p5416_p13, %p5781_p8  ;;  %p5425_p7 = por %p5424_p4, %p5423_p5 }
  0x27   : > { %p5419_p2 = pneg %p5418_p0 }
  0x29   : > { %p5426_p9 = pnand %p5425_p7, %p5419_p2 }
  0x2b   : > { %5429 = shalt.err (!%p5426_p9)
}
  0x2c   : > { %s5655_s30 = smov 64   ;;  %s5656_s12 = smov 4  }
  0x2d   : > { %5062 = dma.hbm_to_vmem [thread:$0]  (!%p5765_p6), %s6388_s1, 5120, %s5754_s22, [#allocation8], %s5655_s30, %s5655_s30, %s5656_s12  }
  0x2e   : > { %s5430_s25 = scalar_lea.hbm %s6371_s5, 5120 }
  0x2f   : > { %p5431_p4 = scmp.ne.s32.totalorder %s6371_s5, %s5430_s25  ;;  %p5437_p12 = scmp.lt.u32.totalorder %s5430_s25, %s6371_s5 }
  0x31   : > { %p5433_p10 = pnand %p5431_p4, %p5781_p8 }
  0x33   : > { %p5434_p11 = pneg %p5433_p10 }
  0x35   : > { %p5439_p13 = pnand %p5437_p12, %p5434_p11 }
  0x37   : > { %5442 = shalt.err (!%p5439_p13)
}
  0x38   : > { %s5443_s22 = scalar_lea.vmem %s5769_s26, 5120  ;;  %p5451_p7 = scmp.lt.s32.totalorder %s5769_s26, %s5769_s26 }
  0x39   : > { %p5444_p0 = scmp.ne.s32.totalorder %s5769_s26, %s5443_s22  ;;  %p5452_p9 = scmp.lt.s32.totalorder %s5443_s22, %s5443_s22 }
  0x3b   : > { %p5446_p2 = pnand %p5444_p0, %p5781_p8  ;;  %p5453_p4 = por %p5452_p9, %p5451_p7 }
  0x3d   : > { %p5447_p5 = pneg %p5446_p2 }
  0x3f   : > { %p5454_p10 = pnand %p5453_p4, %p5447_p5 }
  0x41   : > { %5457 = shalt.err (!%p5454_p10)
}
  0x42   : > { %5068 = dma.hbm_to_vmem [thread:$0]  (!%p5765_p6), %s6371_s5, 5120, %s5769_s26, [#allocation11], %s5655_s30, %s5655_s30, %s5656_s12  }
  0x43   : > { %s5458_s14 = scalar_lea.hbm %s6369_s3, 5120 }
  0x44   : > { %p5459_p11 = scmp.ne.s32.totalorder %s6369_s3, %s5458_s14  ;;  %p5465_p0 = scmp.lt.u32.totalorder %s5458_s14, %s6369_s3 }
  0x46   : > { %p5461_p12 = pnand %p5459_p11, %p5781_p8 }
  0x48   : > { %p5462_p13 = pneg %p5461_p12 }
  0x4a   : > { %p5467_p2 = pnand %p5465_p0, %p5462_p13 }
  0x4c   : > { %5470 = shalt.err (!%p5467_p2)
}
  0x4d   : > { %s5471_s26 = scalar_lea.vmem %s5771_s29, 5120  ;;  %p5479_p4 = scmp.lt.s32.totalorder %s5771_s29, %s5771_s29 }
  0x4e   : > { %p5472_p5 = scmp.ne.s32.totalorder %s5771_s29, %s5471_s26  ;;  %p5480_p10 = scmp.lt.s32.totalorder %s5471_s26, %s5471_s26 }
  0x50   : > { %p5474_p7 = pnand %p5472_p5, %p5781_p8  ;;  %p5481_p11 = por %p5480_p10, %p5479_p4 }
  0x52   : > { %p5475_p9 = pneg %p5474_p7 }
  0x54   : > { %p5482_p12 = pnand %p5481_p11, %p5475_p9 }
  0x56   : > { %5485 = shalt.err (!%p5482_p12)
}
  0x57   : > { %5065 = dma.hbm_to_vmem [thread:$0]  (!%p5765_p6), %s6369_s3, 5120, %s5771_s29, [#allocation8], %s5655_s30, %s5655_s30, %s5656_s12  }
  0x58   : > { %s5657_s10 = smov [#allocation12]   ;;  %s5658_s13 = smov [#allocation13]  }
  0x59   : > { %s357_s11 = sshll.u32 %s5657_s10, 4  ;;  %s373_s14 = sshll.u32 %s5658_s13, 4  ;;  %s358_s11 = int_to_ptr.vmem [resolvable:$true] %s357_s11  ;;  %s374_s14 = int_to_ptr.vmem [resolvable:$true] %s373_s14 }
  0x5a   : > { %s5486_s25 = scalar_lea.hbm %s6373_s7, 5120 }
  0x5b   : > { %p5487_p13 = scmp.ne.s32.totalorder %s6373_s7, %s5486_s25  ;;  %p5493_p5 = scmp.lt.u32.totalorder %s5486_s25, %s6373_s7 }
  0x5d   : > { %p5489_p0 = pnand %p5487_p13, %p5781_p8 }
  0x5f   : > { %p5490_p2 = pneg %p5489_p0 }
  0x61   : > { %p5495_p7 = pnand %p5493_p5, %p5490_p2 }
  0x63   : > { %5498 = shalt.err (!%p5495_p7)
}
  0x64   : > { %s5499_s29 = scalar_lea.vmem %s358_s11, 5120  ;;  %p5507_p11 = scmp.lt.s32.totalorder %s358_s11, %s358_s11 }
  0x65   : > { %p5500_p9 = scmp.ne.s32.totalorder %s358_s11, %s5499_s29  ;;  %p5508_p12 = scmp.lt.s32.totalorder %s5499_s29, %s5499_s29 }
  0x67   : > { %p5502_p4 = pnand %p5500_p9, %p5781_p8  ;;  %p5509_p1 = por %p5508_p12, %p5507_p11 }
  0x69   : > { %p5503_p10 = pneg %p5502_p4 }
  0x6b   : > { %p5510_p3 = pnand %p5509_p1, %p5503_p10 }
  0x6d   : > { %5513 = shalt.err (!%p5510_p3)
}
  0x6e   : > { %5071 = dma.hbm_to_vmem [thread:$0]  (!%p5765_p6), %s6373_s7, 5120, %s358_s11, [#allocation11], %s5655_s30, %s5655_s30, %s5656_s12  }
  0x6f   : > { %s5514_s15 = scalar_lea.hbm %s6375_s9, 5120 }
  0x70   : > { %p5515_p1 = scmp.ne.s32.totalorder %s6375_s9, %s5514_s15  ;;  %p5521_p0 = scmp.lt.u32.totalorder %s5514_s15, %s6375_s9 }
  0x72   : > { %p5517_p3 = pnand %p5515_p1, %p5781_p8 }
  0x74   : > { %p5518_p13 = pneg %p5517_p3 }
  0x76   : > { %p5523_p2 = pnand %p5521_p0, %p5518_p13 }
  0x78   : > { %5526 = shalt.err (!%p5523_p2)
}
  0x79   : > { %s5527_s22 = scalar_lea.vmem %s374_s14, 5120  ;;  %p5535_p4 = scmp.lt.s32.totalorder %s374_s14, %s374_s14 }
  0x7a   : > { %p5528_p5 = scmp.ne.s32.totalorder %s374_s14, %s5527_s22  ;;  %p5536_p10 = scmp.lt.s32.totalorder %s5527_s22, %s5527_s22 }
  0x7c   : > { %p5530_p7 = pnand %p5528_p5, %p5781_p8  ;;  %p5537_p11 = por %p5536_p10, %p5535_p4 }
  0x7e   : > { %p5531_p9 = pneg %p5530_p7 }
  0x80   : > { %p5538_p12 = pnand %p5537_p11, %p5531_p9 }
  0x82   : > { %5541 = shalt.err (!%p5538_p12)
}
  0x83   : > { %5074 = dma.hbm_to_vmem [thread:$0]  (!%p5765_p6), %s6375_s9, 5120, %s374_s14, [#allocation14], %s5655_s30, %s5655_s30, %s5656_s12  }
  0x84   : > { %s4014_s27 = sadd.s32 4294967294, %s5650_s20   ;;  %s5901_s16 = sadd.s32 1, %s5650_s20  }
  0x85   : > { %s37_s1 = sadd.s32 1, %s5646_s19  ;;  %s34_s8 = ssub.s32 %s5650_s20, %s5901_s16 }
  0x86   : > { %p44_p8 = scmp.ne.s32.totalorder %s5646_s19, %s5642_s18  ;;  %p35_p1 = scmp.eq.s32.totalorder %s34_s8, 0 }
  0x87   : > { %p45_p3 = scmp.eq.s32.totalorder %s5650_s20, 0  ;;  %p50_p13 = scmp.ne.s32.totalorder %s5642_s18, %s5638_s17 }
  0x88   : > { %p284_p0 = scmp.eq.s32.totalorder %s5749_s23, 1  ;;  %p6390_p5 = scmp.eq.s32.totalorder %s5749_s23, 0 }
  0x89   : > { %s5913_s10 = scalar_select %p35_p1, %s5646_s19, %s37_s1  }
  0x8a   : > { %p46_p2 = por %p45_p3, %p44_p8  ;;  %p5917_p7 = por %p6390_p5, %p50_p13 }
  0x8b   : > { %p5921_p6 = por %p284_p0, %p44_p8  ;;  %p290_p9 = scmp.eq.s32.totalorder %s4014_s27, 1 }
  0x8c   : > { %p5088_p4 = scmp.lt.s32.totalorder %s5650_s20, 2  ;;  %s390_s12 = sand.u32 1, %s5646_s19  }
  0x8d   : > { %s6392_s30 = scalar_select %p5921_p6, 1, 0 }
  0x8e   : > { %p5927_p10 = por %p290_p9, %p50_p13  ;;  %s4022_s15 = sshll.u32 %s390_s12, 4 }
  0x8f   : > { %s4298_s21 = sshll.u32 %s5650_s20, 8  ;;  %s394_s22 = scalar_lea.vmem [#allocation4], %s4022_s15 }
  0x90   : > { %s6393_s14 = scalar_select %p5927_p10, 1, 0 }
  0x91   : > { %s5935_s26 = scalar_lea.hbm %s6366_s0, %s4298_s21  ;;  %s401_s11 = sshll.u32 %s394_s22, 4  ;;  %s5941_s11 = int_to_ptr.vmem [resolvable:$true] %s401_s11 }
  0x92   : > { %p5937_p11 = pnand %p5088_p4, %p46_p2  ;;  %s5943_s27 = scalar_lea.sflag [#allocation5], %s390_s12 }
  0x93   : > { %s5542_s1 = scalar_lea.hbm %s5935_s26, 256  ;;  %s5547_s21 = scalar_lea.hbm %s6366_s0, 512 }
  0x94   : > { %p5543_p12 = scmp.ne.s32.totalorder %s5935_s26, %s5542_s1  ;;  %p5544_p8 = pneg %p5937_p11 }
  0x95   : > { %p5548_p13 = scmp.lt.u32.totalorder %s5935_s26, %s6366_s0  ;;  %p5549_p0 = scmp.lt.u32.totalorder %s5547_s21, %s5542_s1 }
  0x96   : > { %p5545_p1 = pnand %p5544_p8, %p5543_p12  ;;  %p5551_p5 = scmp.lt.u32.totalorder %s5542_s1, %s5935_s26 }
  0x97   : > { %p5550_p2 = por %p5549_p0, %p5548_p13 }
  0x98   : > { %p5546_p3 = pneg %p5545_p1 }
  0x99   : > { %p5552_p9 = por %p5551_p5, %p5550_p2 }
  0x9b   : > { %p5553_p4 = pnand %p5552_p9, %p5546_p3 }
  0x9d   : > { %5556 = shalt.err (!%p5553_p4)
}
  0x9e   : > { %s5557_s12 = scalar_lea.vmem %s5941_s11, 256  ;;  %s5659_s22 = smov [#allocation4]  }
  0x9f   : > { %p5558_p12 = scmp.ne.s32.totalorder %s5941_s11, %s5557_s12  ;;  %s5562_s8 = sshll.u32 %s5659_s22, 4  ;;  %s5563_s8 = int_to_ptr.vmem [resolvable:$false] %s5562_s8 }
  0xa0   : > { %s5564_s15 = scalar_lea.vmem %s5563_s8, 512  ;;  %p5565_p6 = scmp.lt.s32.totalorder %s5941_s11, %s5563_s8 }
  0xa1   : > { %p5560_p1 = pnand %p5558_p12, %p5544_p8  ;;  %p5566_p13 = scmp.lt.s32.totalorder %s5564_s15, %s5557_s12 }
  0xa3   : > { %p5561_p10 = pneg %p5560_p1  ;;  %p5567_p0 = por %p5566_p13, %p5565_p6 }
  0xa5   : > { %p5568_p2 = pnand %p5567_p0, %p5561_p10 }
  0xa7   : > { %5571 = shalt.err (!%p5568_p2)
}
  0xa8   : > { %s5660_s1 = smov 128   ;;  %s5661_s21 = smov 8  }
  0xa9   : > { %5078 = dma.hbm_to_vmem [thread:$0]  (!%p5937_p11), %s5935_s26, 256, %s5941_s11, %s5943_s27, %s5660_s1, %s5660_s1, %s5661_s21  }
  0xaa   : > { %p6395_p8 = scmp.ne.s32.totalorder %s6386_s24, 0 }
  0xab   : > { %s5974_s25 = sand.u32 (!%p6395_p8), 1, %s5642_s18  }
  0xac   : > { %413 = sbr.rel (%p6395_p8) target bundleno = 1745 (0x6d1), region = 64  ;;  %s4026_s28 = sshll.u32 (!%p6395_p8), %s5974_s25, 4 }
  0xad   : > { %s416_s12 = scalar_lea.sflag (!%p6395_p8), [#allocation5], %s5974_s25  ;;  %s5980_s22 = scalar_lea.vmem (!%p6395_p8), [#allocation4], %s4026_s28 }
  0xb3   : > { %5617 = dma.done.wait (%p5917_p7), %s416_s12, 256  }
  0xb4   : > { %5619 = vsyncadd (%p5917_p7), %s416_s12, 4294967040  ;;  %p6396_p6 = scmp.eq.s32.totalorder %s5749_s23, 0 }
  0xb6   : > { %5621 = dma.done.wait (%p6396_p6), [#allocation8], 10240   ;;  %p6397_p10 = pmov %p6396_p6 }
  0xb7   : > { %p6398_p11 = pmov %p6396_p6 }
  0xb8   : > { %5623 = vsyncadd (%p6397_p10), [#allocation8], 4294957056 }
  0xb9   : > { %5625 = dma.done.wait (%p6398_p11), [#allocation11], 10240   ;;  %p6399_p3 = pmov %p6396_p6 }
  0xbb   : > { %5627 = vsyncadd (%p6399_p3), [#allocation11], 4294957056  ;;  %p6400_p5 = pmov %p6399_p3 }
  0xbc   : > { %p6401_p9 = pmov %p6399_p3 }
  0xbd   : > { %5629 = dma.done.wait (%p6400_p5), [#allocation14], 5120  }
  0xbe   : > { %5631 = vsyncadd (%p6401_p9), [#allocation14], 4294962176  ;;  %v5662_v0 = vmov 0.0   ;;  %v5663_v1 = vmov 0   ;;  %vm5664_vm0 = vmmov 0   ;;  %v5141_v2 = vld [vmem:[#allocation7] sm:$0xff]  }
  0xbf   : > { %4535 = vmatprep.subr.bf16.mxu0 %v5662_v0  ;;  %4555 = vmatprep.subr.bf16.mxu1 %v5662_v0  ;;  %479 = vst [vmem:[#allocation2] sm:$0x1] %v5663_v1  ;;  %v5142_v3 = vld [vmem:[#allocation7 + $0x40] sm:$0xff]   ;;  %v5143_v4 = vld [vmem:[#allocation7 + $0x8] sm:$0xff]   ;;  %v5145_v6 = vld [vmem:[#allocation7 + $0x10] sm:$0xff]   ;;  %vm489_vm1 = vcmask 1040384  }
  0xc0   : > { %4551 = vmatprep.mubr.msk.bf16.mxu0 %vm5664_vm0, %v5662_v0  ;;  %4571 = vmatprep.mubr.msk.bf16.mxu1 %vm5664_vm0, %v5662_v0  ;;  %v5144_v5 = vld [vmem:[#allocation7 + $0x48] sm:$0xff]   ;;  %v5146_v7 = vld [vmem:[#allocation7 + $0x50] sm:$0xff]   ;;  %v5147_v8 = vld [vmem:[#allocation7 + $0x18] sm:$0xff]   ;;  %vm490_vm2 = vcmask 1044484   ;;  %vm500_vm3 = vcmask 125953   ;;  %vm502_vm4 = vcmask 125952  }
  0xc1   : > { %4536 = vmatpush3.bf16.msra.mxu0 %v5141_v2  ;;  %4556 = vmatpush3.bf16.msra.mxu1 %v5142_v3  ;;  %v5148_v9 = vld [vmem:[#allocation7 + $0x58] sm:$0xff]   ;;  %v5149_v10 = vld [vmem:[#allocation7 + $0x20] sm:$0xff]   ;;  %vm506_vm5 = vcmask 1043585   ;;  %v5151_v16 = vld [vmem:[#allocation7 + $0x28] sm:$0xff]   ;;  %vm508_vm6 = vcmask 1043584   ;;  %vm504_vm8 = vcmask 122880  }
  0xc2   : > { %4537 = vmatprep.subr.bf16.mxu0 %v5662_v0  ;;  %4557 = vmatprep.subr.bf16.mxu1 %v5662_v0  ;;  %v5150_v11 = vld [vmem:[#allocation7 + $0x60] sm:$0xff]   ;;  %v482_v13 = vld [vmem:[%s5980_s22 + $0x8] sm:$0xff]  ;;  %vm6017_vm7 = vmor %vm489_vm1, %vm490_vm2  ;;  %vm510_vm9 = vcmask 1040512   ;;  %vm657_vm10 = vsmask.f32 7424  ;;  %vm794_vm11 = vcmask 1046528  }
  0xc3   : > { %v481_v12 = vld [vmem:[%s5980_s22] sm:$0xff]  ;;  %v4300_v15 = vpack.c.bf16 %v482_v13, %v482_v13  ;;  %v5152_v17 = vld [vmem:[#allocation7 + $0x68] sm:$0xff]   ;;  %v5155_v26 = vld [vmem:[#allocation7 + $0x38] sm:$0xff]   ;;  %vm922_vm12 = vsmask.f32 6400  ;;  %vm1064_vm13 = vcmask 1045504  }
  0xc4   : > { %v4299_v14 = vpack.c.bf16 %v481_v12, %v481_v12  ;;  %v5153_v21 = vld [vmem:[#allocation7 + $0x30] sm:$0xff]   ;;  %v5156_v27 = vld [vmem:[#allocation7 + $0x78] sm:$0xff]   ;;  %v5160_v29 = vld [vmem:[#allocation7 + $0x80] sm:$0xff]   ;;  %s6404_s1 = sld [smem:[#allocation22_spill]]  ;;  %s6405_s22 = sld [smem:[#allocation23_spill]] }
  0xc5   : > { %4538 = vmatpush3.bf16.msra.mxu0 %v5143_v4  ;;  %4558 = vmatpush3.bf16.msra.mxu1 %v5144_v5  ;;  %v494_v20 = vrot.slane %v4300_v15, 7  ;;  %v5154_v24 = vld [vmem:[#allocation7 + $0x70] sm:$0xff]   ;;  %v5162_v35 = vld [vmem:[#allocation7 + $0x88] sm:$0xff]   ;;  %v5161_v38 = vld [vmem:[#allocation7 + $0xc0] sm:$0xff]   ;;  %s477_s24 = scalar_lea.vmem [#allocation15], %s4026_s28  ;;  %s4309_s26 = sshll.u32 %s5749_s23, 8 }
  0xc6   : > { %4539 = vmatprep.subr.bf16.mxu0 %v5662_v0  ;;  %4559 = vmatprep.subr.bf16.mxu1 %v5662_v0  ;;  %v492_v19 = vrot.slane %v4299_v14, 7  ;;  %v5164_v40 = vld [vmem:[#allocation7 + $0x90] sm:$0xff]   ;;  %v5163_v44 = vld [vmem:[#allocation7 + $0xc8] sm:$0xff]   ;;  %v5166_v46 = vld [vmem:[#allocation7 + $0x98] sm:$0xff]   ;;  %s3893_s13 = sshll.u32 %s477_s24, 4  ;;  %s6406_s27 = sld [smem:[#allocation24_spill]]  ;;  %s6317_s13 = int_to_ptr.vmem [resolvable:$true] %s3893_s13 }
  0xc7   : > { %v496_v23 = vrot.slane %v494_v20, 4  ;;  %v5165_v49 = vld [vmem:[#allocation7 + $0xd0] sm:$0xff]   ;;  %v5168_v50 = vld [vmem:[#allocation7 + $0xa0] sm:$0xff]   ;;  %v5167_v57 = vld [vmem:[#allocation7 + $0xd8] sm:$0xff]   ;;  %s3880_s28 = scalar_lea.sflag [#allocation6], %s5974_s25  ;;  %s5572_s15 = scalar_lea.vmem %s6317_s13, 256 }
  0xc8   : > { %v493_v22 = vrot.slane %v492_v19, 4  ;;  %501 = vst.msk [vmem:[#allocation2] sm:$0xe] %vm500_vm3, %v492_v19  ;;  %v5170_v58 = vld [vmem:[#allocation7 + $0xa8] sm:$0xff]   ;;  %v5169_v3 = vld [vmem:[#allocation7 + $0xe0] sm:$0xff]   ;;  %v5172_v4 = vld [vmem:[#allocation7 + $0xb0] sm:$0xff]   ;;  %p5573_p7 = scmp.ne.s32.totalorder %s6317_s13, %s5572_s15 }
  0xc9   : > { %4540 = vmatpush3.bf16.msra.mxu0 %v5145_v6  ;;  %4560 = vmatpush3.bf16.msra.mxu1 %v5146_v7  ;;  %507 = vst.msk [vmem:[#allocation2] sm:$0xe] %vm506_vm5, %v5663_v1  ;;  %v5171_v5 = vld [vmem:[#allocation7 + $0xe8] sm:$0xff]   ;;  %v5174_v6 = vld [vmem:[#allocation7 + $0xb8] sm:$0xff]   ;;  %v5173_v7 = vld [vmem:[#allocation7 + $0xf0] sm:$0xff]   ;;  %p6407_p4 = scmp.ne.s32.totalorder %s6392_s30, 0 }
  0xca   : > { %4541 = vmatprep.subr.bf16.mxu0 %v5662_v0  ;;  %4561 = vmatprep.subr.bf16.mxu1 %v5662_v0  ;;  %v495_v25 = vsel %vm6017_vm7, %v493_v22, %v494_v20  ;;  %505 = vst.msk [vmem:[#allocation2 + $0x8] sm:$0x1] %vm504_vm8, %v496_v23  ;;  %v5182_v14 = vld [vmem:[#allocation7 + $0x110] sm:$0xff]   ;;  %v5185_v19 = vld [vmem:[#allocation7 + $0x128] sm:$0xff]   ;;  %v5190_v23 = vld [vmem:[#allocation9] sm:$0xff]   ;;  %s5665_s23 = smov [#allocation15]  }
  0xcb   : > { %503 = vst.msk [vmem:[#allocation2 + $0x4] sm:$0xf] %vm502_vm4, %v495_v25  ;;  %v5186_v20 = vld [vmem:[#allocation7 + $0x130] sm:$0xff]   ;;  %v5192_v25 = vld [vmem:[#allocation9 + $0x40] sm:$0xff]   ;;  %p5574_p12 = pnand %p5573_p7, %p6407_p4 }
  0xcc   : > { %511 = vst.msk [vmem:[#allocation2 + $0x8] sm:$0x1] %vm510_vm9, %v5663_v1  ;;  %s6322_s8 = scalar_lea.hbm %s6406_s27, %s4309_s26 }
  0xcd   : > { %4542 = vmatpush3.bf16.msra.mxu0 %v5147_v8  ;;  %4562 = vmatpush3.bf16.msra.mxu1 %v5148_v9  ;;  %509 = vst.msk [vmem:[#allocation2 + $0x4] sm:$0xf] %vm508_vm6, %v5663_v1  ;;  %v5178_v8 = vld [vmem:[#allocation7 + $0x100] sm:$0xff]   ;;  %p5575_p1 = pneg %p5574_p12 }
  0xce   : > { %4543 = vmatprep.subr.bf16.mxu0 %v5662_v0  ;;  %4563 = vmatprep.subr.bf16.mxu1 %v5662_v0 }
  0xd1   : > { %4544 = vmatpush3.bf16.msra.mxu0 %v5149_v10  ;;  %4564 = vmatpush3.bf16.msra.mxu1 %v5150_v11  ;;  %v5175_v10 = vld [vmem:[#allocation7 + $0xf8] sm:$0xff]   ;;  %v5181_v11 = vld [vmem:[#allocation7 + $0x108] sm:$0xff]  }
  0xd2   : > { %4545 = vmatprep.subr.bf16.mxu0 %v5662_v0  ;;  %4565 = vmatprep.subr.bf16.mxu1 %v5662_v0 }
  0xd3   : > { %v5159_v28 = vld [vmem:[#allocation2 + $0x8] ss:$0 sps:$4 sm:$0x11]  }
  0xd4   : > { %v5157_v30 = vld [vmem:[#allocation2] sm:$0xff]   ;;  %v666_v32 = vshll.u32 %v5159_v28, 16  ;;  %v5180_v45 = vld [vmem:[#allocation2 + $0x8] ss:$0 sps:$4 sm:$0x33]  }
  0xd5   : > { %4546 = vmatpush3.bf16.msra.mxu0 %v5151_v16  ;;  %4566 = vmatpush3.bf16.msra.mxu1 %v5152_v17  ;;  %v5158_v31 = vld [vmem:[#allocation2] sm:$0xff]   ;;  %v5177_v47 = vld [vmem:[#allocation2 + $0x8] ss:$0 sps:$4 sm:$0x11]   ;;  %v932_v53 = vshrl.u32 %v5180_v45, 16  ;;  %v935_v54 = vshll.u32 %v5180_v45, 16 }
  0xd6   : > { %4547 = vmatprep.subr.bf16.mxu0 %v5662_v0  ;;  %4567 = vmatprep.subr.bf16.mxu1 %v5662_v0  ;;  %v659_v33 = vshrl.u32 %v5158_v31, 16  ;;  %v661_v34 = vshll.u32 %v5158_v31, 16  ;;  %v668_v37 = vrot.slane %v666_v32, 1  ;;  %v5176_v41 = vld [vmem:[#allocation2] sm:$0xfe]   ;;  %v796_v55 = vrot.slane %v5177_v47, 1 }
  0xd7   : > { %v5179_v42 = vld [vmem:[#allocation2] sm:$0xfe]   ;;  %v795_v51 = vrot.slane %v5176_v41, 1  ;;  %v6050_v61 = vld [vmem:[#allocation2 + $0x8] ss:$0 sps:$4 sm:$0x33]  }
  0xd8   : > { %v663_v36 = vrot.slane %v661_v34, 1  ;;  %v924_v48 = vshrl.u32 %v5179_v42, 16  ;;  %v927_v52 = vshll.u32 %v5179_v42, 16  ;;  %v6048_v59 = vld [vmem:[#allocation2] sm:$0xfc]   ;;  %v934_v62 = vrot.slane %v932_v53, 1 }
  0xd9   : > { %4548 = vmatpush3.bf16.msra.mxu0 %v5153_v21  ;;  %4568 = vmatpush3.bf16.msra.mxu1 %v5154_v24  ;;  %v937_v63 = vrot.slane %v935_v54, 2  ;;  %v1065_v1 = vrot.slane %v6048_v59, 2  ;;  %v1066_v2 = vrot.slane %v6050_v61, 2  ;;  %v797_v9 = vsel %vm794_vm11, %v795_v51, %v796_v55  ;;  %v5183_v16 = vld [vmem:[#allocation7 + $0x118] sm:$0xff]   ;;  %v5184_v17 = vld [vmem:[#allocation7 + $0x120] sm:$0xff]   ;;  %v5191_v24 = vld [vmem:[#allocation9 + $0x8] sm:$0xff]  }
  0xda   : > { %4549 = vmatprep.subr.bf16.mxu0 %v5662_v0  ;;  %4569 = vmatprep.subr.bf16.mxu1 %v5662_v0  ;;  %v664_v39 = vor.u32 %v663_v36, %v659_v33  ;;  %v926_v56 = vrot.slane %v924_v48, 1  ;;  %v929_v60 = vrot.slane %v927_v52, 2  ;;  %v5187_v21 = vld [vmem:[#allocation7 + $0x138] sm:$0xff]   ;;  %v5199_v32 = vld [vmem:[#allocation9 + $0x28] sm:$0xff]   ;;  %v5200_v33 = vld [vmem:[#allocation9 + $0x60] sm:$0xff]  }
  0xdb   : > { %v938_v13 = vor.u32 %v937_v63, %v934_v62  ;;  %v1067_v22 = vsel %vm1064_vm13, %v1065_v1, %v1066_v2  ;;  %v5195_v28 = vld [vmem:[#allocation9 + $0x18] sm:$0xff]   ;;  %v5201_v34 = vld [vmem:[#allocation9 + $0x30] sm:$0xff]  }
  0xdc   : > { %v669_v43 = vsel %vm657_vm10, %v664_v39, %v668_v37  ;;  %v930_v12 = vor.u32 %v929_v60, %v926_v56  ;;  %v5198_v31 = vld [vmem:[#allocation9 + $0x58] sm:$0xff]   ;;  %v5204_v37 = vld [vmem:[#allocation9 + $0x70] sm:$0xff]  }
  0xdd   : > { %4550 = vmatpush3.bf16.msra.mxu0 %v5155_v26  ;;  %4570 = vmatpush3.bf16.msra.mxu1 %v5156_v27  ;;  %v5193_v26 = vld [vmem:[#allocation9 + $0x10] sm:$0xff]   ;;  %v5194_v27 = vld [vmem:[#allocation9 + $0x48] sm:$0xff]   ;;  %v5203_v36 = vld [vmem:[#allocation9 + $0x38] sm:$0xff]  }
  0xde   : > { %4575 = vmatprep.subr.bf16.mxu0 %v5662_v0  ;;  %4595 = vmatprep.subr.bf16.mxu1 %v5662_v0  ;;  %v939_v15 = vsel %vm922_vm12, %v930_v12, %v938_v13  ;;  %v4084_v62 = vld [vmem:[%s6368_s2] ss:$0 sm:$0xff] }
  0xe0   : > { %4552 = vmatmul.mubr.bf16.vlgmr.msra.gmra.mrb[0].mxu0 %v5157_v30  ;;  %4572 = vmatmul.mubr.bf16.vlgmr.msra.gmra.mrb[0].mxu1 %v669_v43  ;;  %v5197_v30 = vld [vmem:[#allocation9 + $0x20] sm:$0xff]  }
  0xe1   : > { %4576 = vmatpush3.bf16.msra.mxu0 %v5160_v29  ;;  %4591 = vmatprep.mubr.msk.bf16.mxu0 %vm5664_vm0, %v5662_v0  ;;  %v5196_v29 = vld [vmem:[#allocation9 + $0x50] sm:$0xff]  }
  0xe2   : > { %4577 = vmatprep.subr.bf16.mxu0 %v5662_v0  ;;  %4596 = vmatpush3.bf16.msra.mxu1 %v5161_v38  ;;  %v5207_v38 = vld [vmem:[#allocation9 + $0x78] sm:$0xff]  }
  0xe3   : > { %4597 = vmatprep.subr.bf16.mxu1 %v5662_v0  ;;  %4611 = vmatprep.mubr.msk.bf16.mxu1 %vm5664_vm0, %v5662_v0 }
  0xe5   : > { %4578 = vmatpush3.bf16.msra.mxu0 %v5162_v35  ;;  %v5202_v35 = vld [vmem:[#allocation9 + $0x68] sm:$0xff]  }
  0xe6   : > { %4579 = vmatprep.subr.bf16.mxu0 %v5662_v0  ;;  %4598 = vmatpush3.bf16.msra.mxu1 %v5163_v44 }
  0xe7   : > { %4599 = vmatprep.subr.bf16.mxu1 %v5662_v0 }
  0xe9   : > { %4580 = vmatpush3.bf16.msra.mxu0 %v5164_v40 }
  0xea   : > { %4581 = vmatprep.subr.bf16.mxu0 %v5662_v0  ;;  %4600 = vmatpush3.bf16.msra.mxu1 %v5165_v49 }
  0xeb   : > { %4601 = vmatprep.subr.bf16.mxu1 %v5662_v0 }
  0xed   : > { %4582 = vmatpush3.bf16.msra.mxu0 %v5166_v46 }
  0xee   : > { %4583 = vmatprep.subr.bf16.mxu0 %v5662_v0  ;;  %4602 = vmatpush3.bf16.msra.mxu1 %v5167_v57 }
  0xef   : > { %4603 = vmatprep.subr.bf16.mxu1 %v5662_v0 }
  0xf1   : > { %4584 = vmatpush3.bf16.msra.mxu0 %v5168_v50 }
  0xf2   : > { %4585 = vmatprep.subr.bf16.mxu0 %v5662_v0  ;;  %4604 = vmatpush3.bf16.msra.mxu1 %v5169_v3 }
  0xf3   : > { %4605 = vmatprep.subr.bf16.mxu1 %v5662_v0 }
  0xf5   : > { %4586 = vmatpush3.bf16.msra.mxu0 %v5170_v58 }
  0xf6   : > { %4587 = vmatprep.subr.bf16.mxu0 %v5662_v0  ;;  %4606 = vmatpush3.bf16.msra.mxu1 %v5171_v5 }
  0xf7   : > { %4607 = vmatprep.subr.bf16.mxu1 %v5662_v0 }
  0xf9   : > { %4588 = vmatpush3.bf16.msra.mxu0 %v5172_v4 }
  0xfa   : > { %4589 = vmatprep.subr.bf16.mxu0 %v5662_v0  ;;  %4608 = vmatpush3.bf16.msra.mxu1 %v5173_v7 }
  0xfb   : > { %4609 = vmatprep.subr.bf16.mxu1 %v5662_v0 }
  0xfd   : > { %4590 = vmatpush3.bf16.msra.mxu0 %v5174_v6 }
  0xfe   : > { %4615 = vmatprep.subr.bf16.mxu0 %v5662_v0  ;;  %4610 = vmatpush3.bf16.msra.mxu1 %v5175_v10 }
  0xff   : > { %4635 = vmatprep.subr.bf16.mxu1 %v5662_v0 }
 0x100   : > { %4592 = vmatmul.mubr.bf16.vlgmr.msra.gmra.mrb[4].mxu0 %v797_v9 }
 0x101   : > { %4616 = vmatpush3.bf16.msra.mxu0 %v5178_v8  ;;  %4631 = vmatprep.mubr.msk.bf16.mxu0 %vm5664_vm0, %v5662_v0 }
 0x102   : > { %4617 = vmatprep.subr.bf16.mxu0 %v5662_v0  ;;  %4612 = vmatmul.mubr.bf16.vlgmr.msra.gmra.mrb[4].mxu1 %v939_v15 }
 0x103   : > { %4651 = vmatprep.mubr.msk.bf16.mxu1 %vm5664_vm0, %v5662_v0  ;;  %4636 = vmatpush3.bf16.msra.mxu1 %v5190_v23 }
 0x104   : > { %4637 = vmatprep.subr.bf16.mxu1 %v5662_v0 }
 0x105   : > { %4618 = vmatpush3.bf16.msra.mxu0 %v5181_v11 }
 0x106   : > { %4619 = vmatprep.subr.bf16.mxu0 %v5662_v0 }
 0x107   : > { %4638 = vmatpush3.bf16.msra.mxu1 %v5191_v24 }
 0x108   : > { %4639 = vmatprep.subr.bf16.mxu1 %v5662_v0 }
 0x109   : > { %4620 = vmatpush3.bf16.msra.mxu0 %v5182_v14 }
 0x10a   : > { %4621 = vmatprep.subr.bf16.mxu0 %v5662_v0 }
 0x10b   : > { %4640 = vmatpush3.bf16.msra.mxu1 %v5193_v26 }
 0x10c   : > { %4641 = vmatprep.subr.bf16.mxu1 %v5662_v0 }
 0x10d   : > { %4622 = vmatpush3.bf16.msra.mxu0 %v5183_v16  ;;  %v5206_v16 = vld [vmem:[#allocation9 + $0x80] sm:$0xff]  }
 0x10e   : > { %4623 = vmatprep.subr.bf16.mxu0 %v5662_v0 }
 0x10f   : > { %4642 = vmatpush3.bf16.msra.mxu1 %v5195_v28  ;;  %v5211_v28 = vld [vmem:[#allocation9 + $0xc0] sm:$0xff]  }
 0x110   : > { %4643 = vmatprep.subr.bf16.mxu1 %v5662_v0 }
 0x111   : > { %4624 = vmatpush3.bf16.msra.mxu0 %v5184_v17 }
 0x112   : > { %4625 = vmatprep.subr.bf16.mxu0 %v5662_v0 }
 0x113   : > { %4644 = vmatpush3.bf16.msra.mxu1 %v5197_v30 }
 0x114   : > { %4645 = vmatprep.subr.bf16.mxu1 %v5662_v0 }
 0x115   : > { %4626 = vmatpush3.bf16.msra.mxu0 %v5185_v19 }
 0x116   : > { %4627 = vmatprep.subr.bf16.mxu0 %v5662_v0 }
 0x117   : > { %4646 = vmatpush3.bf16.msra.mxu1 %v5199_v32  ;;  %v5214_v32 = vld [vmem:[#allocation9 + $0x98] sm:$0xff]  }
 0x118   : > { %4647 = vmatprep.subr.bf16.mxu1 %v5662_v0 }
 0x119   : > { %4628 = vmatpush3.bf16.msra.mxu0 %v5186_v20 }
 0x11a   : > { %4629 = vmatprep.subr.bf16.mxu0 %v5662_v0 }
 0x11b   : > { %4648 = vmatpush3.bf16.msra.mxu1 %v5201_v34  ;;  %v5216_v34 = vld [vmem:[#allocation9 + $0xa0] sm:$0xff]  }
 0x11c   : > { %4649 = vmatprep.subr.bf16.mxu1 %v5662_v0 }
 0x11d   : > { %4630 = vmatpush3.bf16.msra.mxu0 %v5187_v21  ;;  %v5208_v21 = vld [vmem:[#allocation9 + $0x88] sm:$0xff]  }
 0x11e   : > { %4655 = vmatprep.subr.bf16.mxu0 %v5662_v0 }
 0x11f   : > { %4650 = vmatpush3.bf16.msra.mxu1 %v5203_v36  ;;  %v5218_v36 = vld [vmem:[#allocation9 + $0xa8] sm:$0xff]  }
 0x120   : > { %4632 = vmatmul.mubr.bf16.vlgmr.msra.gmra.mrb[8].mxu0 %v1067_v22  ;;  %4675 = vmatprep.subr.bf16.mxu1 %v5662_v0 }
 0x121   : > { %4671 = vmatprep.mubr.msk.bf16.mxu0 %vm5664_vm0, %v5662_v0  ;;  %4656 = vmatpush3.bf16.msra.mxu0 %v5192_v25 }
 0x122   : > { %4657 = vmatprep.subr.bf16.mxu0 %v5662_v0 }
 0x125   : > { %4658 = vmatpush3.bf16.msra.mxu0 %v5194_v27 }
 0x126   : > { %4659 = vmatprep.subr.bf16.mxu0 %v5662_v0 }
 0x129   : > { %4660 = vmatpush3.bf16.msra.mxu0 %v5196_v29  ;;  %v5212_v29 = vld [vmem:[#allocation9 + $0x90] sm:$0xff]  }
 0x12a   : > { %4661 = vmatprep.subr.bf16.mxu0 %v5662_v0 }
 0x12d   : > { %4662 = vmatpush3.bf16.msra.mxu0 %v5198_v31  ;;  %v5213_v31 = vld [vmem:[#allocation9 + $0xc8] sm:$0xff]  }
 0x12e   : > { %4663 = vmatprep.subr.bf16.mxu0 %v5662_v0 }
 0x131   : > { %4664 = vmatpush3.bf16.msra.mxu0 %v5200_v33  ;;  %v5215_v33 = vld [vmem:[#allocation9 + $0xd0] sm:$0xff]  }
 0x132   : > { %4665 = vmatprep.subr.bf16.mxu0 %v5662_v0 }
 0x135   : > { %4666 = vmatpush3.bf16.msra.mxu0 %v5202_v35  ;;  %v5217_v35 = vld [vmem:[#allocation9 + $0xd8] sm:$0xff]  }
 0x136   : > { %4667 = vmatprep.subr.bf16.mxu0 %v5662_v0 }
 0x139   : > { %4668 = vmatpush3.bf16.msra.mxu0 %v5204_v37  ;;  %v5219_v37 = vld [vmem:[#allocation9 + $0xe0] sm:$0xff]  }
 0x13a   : > { %4669 = vmatprep.subr.bf16.mxu0 %v5662_v0 }
 0x13d   : > { %4670 = vmatpush3.bf16.msra.mxu0 %v5207_v38  ;;  %v5220_v38 = vld [vmem:[#allocation9 + $0xb0] sm:$0xff]  }
 0x13e   : > { %4695 = vmatprep.subr.bf16.mxu0 %v5662_v0 }
 0x1b3   : > { %v618_v39 = vpop.f32.mrb[0].mxu0  ;;  %v753_v43 = vpop.f32.mrb[0].mxu1 }
 0x1b4   : > { %v4553_v40 = vpop.f32.mrb[1].mxu0  ;;  %v760_v44 = vadd.f32 %v753_v43, %v618_v39  ;;  %v4573_v45 = vpop.f32.mrb[1].mxu1  ;;  %v5221_v43 = vld [vmem:[#allocation9 + $0xe8] sm:$0xff]  }
 0x1b5   : > { %v621_v41 = vpop.f32.mrb[2].mxu0  ;;  %v756_v46 = vpop.f32.mrb[2].mxu1 }
 0x1b6   : > { %v4554_v42 = vpop.f32.mrb[3].mxu0  ;;  %v761_v47 = vadd.f32 %v756_v46, %v621_v41  ;;  %v4574_v48 = vpop.f32.mrb[3].mxu1 }
 0x1d3   : > { %v881_v49 = vpop.f32.mrb[4].mxu0 }
 0x1d4   : > { %v888_v50 = vadd.f32 %v881_v49, %v760_v44  ;;  %v4593_v51 = vpop.f32.mrb[5].mxu0  ;;  %v5222_v44 = vld [vmem:[#allocation9 + $0xb8] sm:$0xff]  }
 0x1d5   : > { %v884_v52 = vpop.f32.mrb[6].mxu0  ;;  %v1023_v55 = vpop.f32.mrb[4].mxu1  ;;  %v5225_v51 = vld [vmem:[#allocation9 + $0xf0] sm:$0xff]  }
 0x1d6   : > { %v889_v53 = vadd.f32 %v884_v52, %v761_v47  ;;  %v4594_v54 = vpop.f32.mrb[7].mxu0  ;;  %v1030_v56 = vadd.f32 %v1023_v55, %v888_v50  ;;  %v4613_v57 = vpop.f32.mrb[5].mxu1  ;;  %v5226_v52 = vld [vmem:[#allocation9 + $0x100] sm:$0xff]  }
 0x1d7   : > { %v1026_v58 = vpop.f32.mrb[6].mxu1 }
 0x1d8   : > { %v1031_v59 = vadd.f32 %v1026_v58, %v889_v53  ;;  %v4614_v60 = vpop.f32.mrb[7].mxu1  ;;  %v5227_v58 = vld [vmem:[#allocation9 + $0xf8] sm:$0xff]  }
 0x1f3   : > { %v1151_v61 = vpop.f32.mrb[8].mxu0 }
 0x1f4   : > { %v1158_v63 = vadd.f32 %v1151_v61, %v1030_v56  ;;  %v4633_v1 = vpop.f32.mrb[9].mxu0 }
 0x1f5   : > { %v1154_v2 = vpop.f32.mrb[10].mxu0  ;;  %v5232_v1 = vld [vmem:[#allocation9 + $0x118] sm:$0xff]  }
 0x1f6   : > { %v1171_v3 = vadd.f32 %v4084_v62, %v1158_v63  ;;  %v1159_v4 = vadd.f32 %v1154_v2, %v1031_v59  ;;  %v4634_v5 = vpop.f32.mrb[11].mxu0  ;;  %v5228_v59 = vld [vmem:[#allocation9 + $0x108] sm:$0xff]   ;;  %v5233_v2 = vld [vmem:[#allocation9 + $0x120] sm:$0xff]  }
 0x1f8   : > { %5386 = vtanh.f32 %v1171_v3  ;;  %v1172_v6 = vadd.f32 %v4084_v62, %v1159_v4  ;;  %v5231_v62 = vld [vmem:[#allocation9 + $0x110] sm:$0xff]   ;;  %v5234_v3 = vld [vmem:[#allocation9 + $0x128] sm:$0xff]  }
 0x1f9   : > { %v5235_v4 = vld [vmem:[#allocation9 + $0x130] sm:$0xff]  }
 0x1fa   : > { %5388 = vtanh.f32 %v1172_v6 }
 0x202   : > { %v5387_v7 = vpop.eup %5386 }
 0x203   : > { %v4301_v8 = vpack.c.bf16 %v5387_v7, %v5387_v7  ;;  %v5236_v7 = vld [vmem:[#allocation9 + $0x138] sm:$0xff]  }
 0x204   : > { %v5389_v9 = vpop.eup %5388 }
 0x205   : > { %v1181_v10 = vrot.slane %v4301_v8, 7  ;;  %v4302_v11 = vpack.c.bf16 %v5389_v9, %v5389_v9 }
 0x207   : > { %v1182_v12 = vrot.slane %v1181_v10, 4  ;;  %1189 = vst [vmem:[#allocation2] sm:$0xe] %v1181_v10  ;;  %v1183_v13 = vrot.slane %v4302_v11, 7  ;;  %v5239_v11 = vld [vmem:[#allocation10] sm:$0xff]  }
 0x209   : > { %v1184_v14 = vsel %vm6017_vm7, %v1182_v12, %v1183_v13  ;;  %v1185_v15 = vrot.slane %v1183_v13, 4  ;;  %v5240_v12 = vld [vmem:[#allocation10 + $0x8] sm:$0xff]   ;;  %v5241_v13 = vld [vmem:[#allocation10 + $0x40] sm:$0xff]  }
 0x20a   : > { %1190 = vst [vmem:[#allocation2 + $0x4] sm:$0xf] %v1184_v14  ;;  %v5242_v14 = vld [vmem:[#allocation10 + $0x10] sm:$0xff]  }
 0x20b   : > { %1191 = vst [vmem:[#allocation2 + $0x8] sm:$0x1] %v1185_v15  ;;  %v5243_v15 = vld [vmem:[#allocation10 + $0x48] sm:$0xff]  }
 0x211   : > { %v5205_v17 = vld [vmem:[#allocation2] sm:$0xff]  }
 0x212   : > { %v5209_v19 = vld [vmem:[#allocation2] sm:$0xff]   ;;  %v5210_v20 = vld [vmem:[#allocation2 + $0x8] ss:$0 sps:$4 sm:$0x11]   ;;  %4652 = vmatmul.mubr.bf16.vlgmr.msra.gmra.mrb[8].mxu1 %v5205_v17 }
 0x213   : > { %4676 = vmatpush3.bf16.msra.mxu1 %v5206_v16  ;;  %v1340_v22 = vshll.u32 %v5209_v19, 16  ;;  %v1345_v23 = vshll.u32 %v5210_v20, 16  ;;  %4691 = vmatprep.mubr.msk.bf16.mxu1 %vm5664_vm0, %v5662_v0  ;;  %v1338_v24 = vshrl.u32 %v5209_v19, 16  ;;  %v5223_v39 = vld [vmem:[#allocation2] sm:$0xfe]   ;;  %v5246_v19 = vld [vmem:[#allocation10 + $0x20] sm:$0xff]  }
 0x214   : > { %4677 = vmatprep.subr.bf16.mxu1 %v5662_v0  ;;  %v5224_v40 = vld [vmem:[#allocation2 + $0x8] ss:$0 sps:$4 sm:$0x11]   ;;  %v5229_v41 = vld [vmem:[#allocation2] sm:$0xfe]   ;;  %v1473_v45 = vrot.slane %v5223_v39, 1 }
 0x215   : > { %v1342_v25 = vrot.slane %v1340_v22, 1  ;;  %v1347_v26 = vrot.slane %v1345_v23, 1  ;;  %v5230_v42 = vld [vmem:[#allocation2 + $0x8] ss:$0 sps:$4 sm:$0x33]   ;;  %v1474_v46 = vrot.slane %v5224_v40, 1 }
 0x216   : > { %v1601_v47 = vshrl.u32 %v5229_v41, 16  ;;  %v1604_v48 = vshll.u32 %v5229_v41, 16  ;;  %v1609_v49 = vshrl.u32 %v5230_v42, 16  ;;  %v1612_v50 = vshll.u32 %v5230_v42, 16  ;;  %v5237_v5 = vld [vmem:[#allocation2] sm:$0xfc]  }
 0x217   : > { %4678 = vmatpush3.bf16.msra.mxu1 %v5208_v21  ;;  %v1343_v27 = vor.u32 %v1342_v25, %v1338_v24  ;;  %v1475_v53 = vsel %vm794_vm11, %v1473_v45, %v1474_v46  ;;  %v5238_v6 = vld [vmem:[#allocation2 + $0x8] ss:$0 sps:$4 sm:$0x33]   ;;  %v1741_v8 = vrot.slane %v5237_v5, 2  ;;  %v5245_v17 = vld [vmem:[#allocation10 + $0x50] sm:$0xff]   ;;  %v5248_v21 = vld [vmem:[#allocation10 + $0x28] sm:$0xff]  }
 0x218   : > { %4679 = vmatprep.subr.bf16.mxu1 %v5662_v0  ;;  %v1603_v54 = vrot.slane %v1601_v47, 1  ;;  %v1606_v55 = vrot.slane %v1604_v48, 2  ;;  %v1611_v56 = vrot.slane %v1609_v49, 1  ;;  %v1614_v57 = vrot.slane %v1612_v50, 2  ;;  %v5244_v16 = vld [vmem:[#allocation10 + $0x18] sm:$0xff]   ;;  %v5249_v22 = vld [vmem:[#allocation10 + $0x60] sm:$0xff]  }
 0x219   : > { %v1348_v30 = vsel %vm657_vm10, %v1343_v27, %v1347_v26  ;;  %v1742_v9 = vrot.slane %v5238_v6, 2  ;;  %v5247_v20 = vld [vmem:[#allocation10 + $0x58] sm:$0xff]   ;;  %v5250_v23 = vld [vmem:[#allocation10 + $0x30] sm:$0xff]   ;;  %v5251_v24 = vld [vmem:[#allocation10 + $0x68] sm:$0xff]  }
 0x21a   : > { %4672 = vmatmul.mubr.bf16.vlgmr.msra.gmra.mrb[12].mxu0 %v1348_v30  ;;  %v1607_v60 = vor.u32 %v1606_v55, %v1603_v54  ;;  %v1615_v61 = vor.u32 %v1614_v57, %v1611_v56  ;;  %v5252_v25 = vld [vmem:[#allocation10 + $0x38] sm:$0xff]   ;;  %v5253_v26 = vld [vmem:[#allocation10 + $0x70] sm:$0xff]   ;;  %v5255_v5 = vld [vmem:[#allocation10 + $0x80] sm:$0xff]  }
 0x21b   : > { %4696 = vmatpush3.bf16.msra.mxu0 %v5211_v28  ;;  %4680 = vmatpush3.bf16.msra.mxu1 %v5212_v29  ;;  %v1743_v10 = vsel %vm1064_vm13, %v1741_v8, %v1742_v9  ;;  %v5256_v27 = vld [vmem:[#allocation10 + $0x78] sm:$0xff]   ;;  %v5257_v9 = vld [vmem:[#allocation10 + $0x88] sm:$0xff]  }
 0x21c   : > { %4697 = vmatprep.subr.bf16.mxu0 %v5662_v0  ;;  %4681 = vmatprep.subr.bf16.mxu1 %v5662_v0  ;;  %v1616_v63 = vsel %vm922_vm12, %v1607_v60, %v1615_v61 }
 0x21d   : > { %4711 = vmatprep.mubr.msk.bf16.mxu0 %vm5664_vm0, %v5662_v0 }
 0x21f   : > { %4698 = vmatpush3.bf16.msra.mxu0 %v5213_v31  ;;  %4682 = vmatpush3.bf16.msra.mxu1 %v5214_v32 }
 0x220   : > { %4699 = vmatprep.subr.bf16.mxu0 %v5662_v0  ;;  %4683 = vmatprep.subr.bf16.mxu1 %v5662_v0 }
 0x223   : > { %4700 = vmatpush3.bf16.msra.mxu0 %v5215_v33  ;;  %4684 = vmatpush3.bf16.msra.mxu1 %v5216_v34 }
 0x224   : > { %4701 = vmatprep.subr.bf16.mxu0 %v5662_v0  ;;  %4685 = vmatprep.subr.bf16.mxu1 %v5662_v0 }
 0x227   : > { %4702 = vmatpush3.bf16.msra.mxu0 %v5217_v35  ;;  %4686 = vmatpush3.bf16.msra.mxu1 %v5218_v36 }
 0x228   : > { %4703 = vmatprep.subr.bf16.mxu0 %v5662_v0  ;;  %4687 = vmatprep.subr.bf16.mxu1 %v5662_v0 }
 0x22b   : > { %4704 = vmatpush3.bf16.msra.mxu0 %v5219_v37  ;;  %4688 = vmatpush3.bf16.msra.mxu1 %v5220_v38 }
 0x22c   : > { %4705 = vmatprep.subr.bf16.mxu0 %v5662_v0  ;;  %4689 = vmatprep.subr.bf16.mxu1 %v5662_v0 }
 0x22f   : > { %4706 = vmatpush3.bf16.msra.mxu0 %v5221_v43  ;;  %4690 = vmatpush3.bf16.msra.mxu1 %v5222_v44 }
 0x230   : > { %4707 = vmatprep.subr.bf16.mxu0 %v5662_v0  ;;  %4715 = vmatprep.subr.bf16.mxu1 %v5662_v0 }
 0x232   : > { %4692 = vmatmul.mubr.bf16.vlgmr.msra.gmra.mrb[12].mxu1 %v1475_v53 }
 0x233   : > { %4708 = vmatpush3.bf16.msra.mxu0 %v5225_v51  ;;  %4716 = vmatpush3.bf16.msra.mxu1 %v5226_v52  ;;  %v4136_v51 = vld [vmem:[%s6370_s4] ss:$0 sm:$0xff] }
 0x234   : > { %4709 = vmatprep.subr.bf16.mxu0 %v5662_v0  ;;  %4717 = vmatprep.subr.bf16.mxu1 %v5662_v0 }
 0x235   : > { %4731 = vmatprep.mubr.msk.bf16.mxu1 %vm5664_vm0, %v5662_v0 }
 0x237   : > { %4710 = vmatpush3.bf16.msra.mxu0 %v5227_v58  ;;  %4718 = vmatpush3.bf16.msra.mxu1 %v5228_v59 }
 0x238   : > { %4719 = vmatprep.subr.bf16.mxu1 %v5662_v0  ;;  %4735 = vmatprep.subr.bf16.mxu0 %v5662_v0 }
 0x23a   : > { %4712 = vmatmul.mubr.bf16.vlgmr.msra.gmra.mrb[16].mxu0 %v1616_v63 }
 0x23b   : > { %4720 = vmatpush3.bf16.msra.mxu1 %v5231_v62  ;;  %4751 = vmatprep.mubr.msk.bf16.mxu0 %vm5664_vm0, %v5662_v0 }
 0x23c   : > { %4721 = vmatprep.subr.bf16.mxu1 %v5662_v0  ;;  %4736 = vmatpush3.bf16.msra.mxu0 %v5239_v11 }
 0x23d   : > { %4737 = vmatprep.subr.bf16.mxu0 %v5662_v0 }
 0x23f   : > { %4722 = vmatpush3.bf16.msra.mxu1 %v5232_v1 }
 0x240   : > { %4723 = vmatprep.subr.bf16.mxu1 %v5662_v0  ;;  %4738 = vmatpush3.bf16.msra.mxu0 %v5240_v12 }
 0x241   : > { %4739 = vmatprep.subr.bf16.mxu0 %v5662_v0 }
 0x243   : > { %4724 = vmatpush3.bf16.msra.mxu1 %v5233_v2 }
 0x244   : > { %4725 = vmatprep.subr.bf16.mxu1 %v5662_v0  ;;  %4740 = vmatpush3.bf16.msra.mxu0 %v5242_v14 }
 0x245   : > { %4741 = vmatprep.subr.bf16.mxu0 %v5662_v0 }
 0x247   : > { %4726 = vmatpush3.bf16.msra.mxu1 %v5234_v3 }
 0x248   : > { %4727 = vmatprep.subr.bf16.mxu1 %v5662_v0  ;;  %4742 = vmatpush3.bf16.msra.mxu0 %v5244_v16  ;;  %v5260_v16 = vld [vmem:[#allocation10 + $0xc0] sm:$0xff]  }
 0x249   : > { %4743 = vmatprep.subr.bf16.mxu0 %v5662_v0 }
 0x24b   : > { %4728 = vmatpush3.bf16.msra.mxu1 %v5235_v4 }
 0x24c   : > { %4729 = vmatprep.subr.bf16.mxu1 %v5662_v0  ;;  %4744 = vmatpush3.bf16.msra.mxu0 %v5246_v19 }
 0x24d   : > { %4745 = vmatprep.subr.bf16.mxu0 %v5662_v0 }
 0x24f   : > { %4730 = vmatpush3.bf16.msra.mxu1 %v5236_v7 }
 0x250   : > { %4755 = vmatprep.subr.bf16.mxu1 %v5662_v0  ;;  %4746 = vmatpush3.bf16.msra.mxu0 %v5248_v21  ;;  %v5263_v21 = vld [vmem:[#allocation10 + $0x98] sm:$0xff]  }
 0x251   : > { %4747 = vmatprep.subr.bf16.mxu0 %v5662_v0 }
 0x252   : > { %4732 = vmatmul.mubr.bf16.vlgmr.msra.gmra.mrb[16].mxu1 %v1743_v10 }
 0x253   : > { %4771 = vmatprep.mubr.msk.bf16.mxu1 %vm5664_vm0, %v5662_v0  ;;  %4756 = vmatpush3.bf16.msra.mxu1 %v5241_v13 }
 0x254   : > { %4757 = vmatprep.subr.bf16.mxu1 %v5662_v0  ;;  %4748 = vmatpush3.bf16.msra.mxu0 %v5250_v23  ;;  %v5265_v23 = vld [vmem:[#allocation10 + $0xa0] sm:$0xff]  }
 0x255   : > { %4749 = vmatprep.subr.bf16.mxu0 %v5662_v0 }
 0x257   : > { %4758 = vmatpush3.bf16.msra.mxu1 %v5243_v15 }
 0x258   : > { %4759 = vmatprep.subr.bf16.mxu1 %v5662_v0  ;;  %4750 = vmatpush3.bf16.msra.mxu0 %v5252_v25  ;;  %v5267_v25 = vld [vmem:[#allocation10 + $0xa8] sm:$0xff]  }
 0x259   : > { %4775 = vmatprep.subr.bf16.mxu0 %v5662_v0 }
 0x25b   : > { %4760 = vmatpush3.bf16.msra.mxu1 %v5245_v17  ;;  %v5261_v17 = vld [vmem:[#allocation10 + $0x90] sm:$0xff]  }
 0x25c   : > { %4761 = vmatprep.subr.bf16.mxu1 %v5662_v0 }
 0x25f   : > { %4762 = vmatpush3.bf16.msra.mxu1 %v5247_v20  ;;  %v5262_v20 = vld [vmem:[#allocation10 + $0xc8] sm:$0xff]  }
 0x260   : > { %4763 = vmatprep.subr.bf16.mxu1 %v5662_v0 }
 0x263   : > { %4764 = vmatpush3.bf16.msra.mxu1 %v5249_v22  ;;  %v5264_v22 = vld [vmem:[#allocation10 + $0xd0] sm:$0xff]  }
 0x264   : > { %4765 = vmatprep.subr.bf16.mxu1 %v5662_v0 }
 0x267   : > { %4766 = vmatpush3.bf16.msra.mxu1 %v5251_v24  ;;  %v5266_v24 = vld [vmem:[#allocation10 + $0xd8] sm:$0xff]  }
 0x268   : > { %4767 = vmatprep.subr.bf16.mxu1 %v5662_v0 }
 0x26b   : > { %4768 = vmatpush3.bf16.msra.mxu1 %v5253_v26  ;;  %v5268_v26 = vld [vmem:[#allocation10 + $0xe0] sm:$0xff]  }
 0x26c   : > { %4769 = vmatprep.subr.bf16.mxu1 %v5662_v0 }
 0x26f   : > { %4770 = vmatpush3.bf16.msra.mxu1 %v5256_v27  ;;  %v5269_v27 = vld [vmem:[#allocation10 + $0xb0] sm:$0xff]  }
 0x270   : > { %4795 = vmatprep.subr.bf16.mxu1 %v5662_v0 }
 0x2e5   : > { %v1298_v28 = vpop.f32.mrb[8].mxu1 }
 0x2e6   : > { %v4653_v29 = vpop.f32.mrb[9].mxu1 }
 0x2e7   : > { %v1301_v30 = vpop.f32.mrb[10].mxu1 }
 0x2e8   : > { %v4654_v31 = vpop.f32.mrb[11].mxu1 }
 0x2ed   : > { %v1432_v32 = vpop.f32.mrb[12].mxu0 }
 0x2ee   : > { %v1439_v33 = vadd.f32 %v1432_v32, %v1298_v28  ;;  %v4673_v34 = vpop.f32.mrb[13].mxu0  ;;  %v5270_v32 = vld [vmem:[#allocation10 + $0xe8] sm:$0xff]  }
 0x2ef   : > { %v1435_v35 = vpop.f32.mrb[14].mxu0 }
 0x2f0   : > { %v1440_v36 = vadd.f32 %v1435_v35, %v1301_v30  ;;  %v4674_v37 = vpop.f32.mrb[15].mxu0 }
 0x305   : > { %v1559_v38 = vpop.f32.mrb[12].mxu1 }
 0x306   : > { %v1566_v39 = vadd.f32 %v1559_v38, %v1439_v33  ;;  %v4693_v40 = vpop.f32.mrb[13].mxu1  ;;  %v5271_v33 = vld [vmem:[#allocation10 + $0xb8] sm:$0xff]  }
 0x307   : > { %v1562_v41 = vpop.f32.mrb[14].mxu1  ;;  %v5274_v40 = vld [vmem:[#allocation10 + $0xf0] sm:$0xff]  }
 0x308   : > { %v1567_v42 = vadd.f32 %v1562_v41, %v1440_v36  ;;  %v4694_v43 = vpop.f32.mrb[15].mxu1  ;;  %v5275_v41 = vld [vmem:[#allocation10 + $0x100] sm:$0xff]  }
 0x30d   : > { %v1700_v44 = vpop.f32.mrb[16].mxu0 }
 0x30e   : > { %v1707_v45 = vadd.f32 %v1700_v44, %v1566_v39  ;;  %v4713_v46 = vpop.f32.mrb[17].mxu0 }
 0x30f   : > { %v1703_v47 = vpop.f32.mrb[18].mxu0 }
 0x310   : > { %v1708_v48 = vadd.f32 %v1703_v47, %v1567_v42  ;;  %v4714_v49 = vpop.f32.mrb[19].mxu0  ;;  %v5276_v47 = vld [vmem:[#allocation10 + $0xf8] sm:$0xff]  }
 0x325   : > { %v1827_v50 = vpop.f32.mrb[16].mxu1 }
 0x326   : > { %v1834_v52 = vadd.f32 %v1827_v50, %v1707_v45  ;;  %v4733_v53 = vpop.f32.mrb[17].mxu1 }
 0x327   : > { %v1830_v54 = vpop.f32.mrb[18].mxu1  ;;  %v5281_v53 = vld [vmem:[#allocation10 + $0x118] sm:$0xff]  }
 0x328   : > { %v1847_v55 = vadd.f32 %v4136_v51, %v1834_v52  ;;  %v1835_v56 = vadd.f32 %v1830_v54, %v1708_v48  ;;  %v4734_v57 = vpop.f32.mrb[19].mxu1  ;;  %v5277_v48 = vld [vmem:[#allocation10 + $0x108] sm:$0xff]   ;;  %v5282_v54 = vld [vmem:[#allocation10 + $0x120] sm:$0xff]  }
 0x32a   : > { %5390 = vtanh.f32 %v1847_v55  ;;  %v1848_v58 = vadd.f32 %v4136_v51, %v1835_v56  ;;  %v5280_v51 = vld [vmem:[#allocation10 + $0x110] sm:$0xff]   ;;  %v5283_v55 = vld [vmem:[#allocation10 + $0x128] sm:$0xff]  }
 0x32b   : > { %v5284_v56 = vld [vmem:[#allocation10 + $0x130] sm:$0xff]  }
 0x32c   : > { %5392 = vtanh.f32 %v1848_v58 }
 0x334   : > { %v5391_v59 = vpop.eup %5390 }
 0x335   : > { %v4303_v60 = vpack.c.bf16 %v5391_v59, %v5391_v59  ;;  %v5285_v59 = vld [vmem:[#allocation10 + $0x138] sm:$0xff]  }
 0x336   : > { %v5393_v61 = vpop.eup %5392 }
 0x337   : > { %v1857_v62 = vrot.slane %v4303_v60, 7  ;;  %v4304_v63 = vpack.c.bf16 %v5393_v61, %v5393_v61 }
 0x339   : > { %v1858_v1 = vrot.slane %v1857_v62, 4  ;;  %1865 = vst [vmem:[#allocation2] sm:$0xe] %v1857_v62  ;;  %v1859_v2 = vrot.slane %v4304_v63, 7  ;;  %v5288_v63 = vld [vmem:[#allocation12] sm:$0xff]  }
 0x33b   : > { %v1860_v3 = vsel %vm6017_vm7, %v1858_v1, %v1859_v2  ;;  %v1861_v4 = vrot.slane %v1859_v2, 4  ;;  %v5289_v1 = vld [vmem:[#allocation12 + $0x8] sm:$0xff]   ;;  %v5290_v2 = vld [vmem:[#allocation12 + $0x40] sm:$0xff]  }
 0x33c   : > { %1866 = vst [vmem:[#allocation2 + $0x4] sm:$0xf] %v1860_v3  ;;  %v5291_v3 = vld [vmem:[#allocation12 + $0x10] sm:$0xff]  }
 0x33d   : > { %1867 = vst [vmem:[#allocation2 + $0x8] sm:$0x1] %v1861_v4  ;;  %v5292_v4 = vld [vmem:[#allocation12 + $0x48] sm:$0xff]  }
 0x343   : > { %v5254_v6 = vld [vmem:[#allocation2] sm:$0xff]  }
 0x344   : > { %v5258_v7 = vld [vmem:[#allocation2] sm:$0xff]   ;;  %v5259_v8 = vld [vmem:[#allocation2 + $0x8] ss:$0 sps:$4 sm:$0x11]   ;;  %4752 = vmatmul.mubr.bf16.vlgmr.msra.gmra.mrb[20].mxu0 %v5254_v6 }
 0x345   : > { %4776 = vmatpush3.bf16.msra.mxu0 %v5255_v5  ;;  %v2016_v10 = vshll.u32 %v5258_v7, 16  ;;  %v2021_v11 = vshll.u32 %v5259_v8, 16  ;;  %4791 = vmatprep.mubr.msk.bf16.mxu0 %vm5664_vm0, %v5662_v0  ;;  %v2014_v12 = vshrl.u32 %v5258_v7, 16  ;;  %v5272_v28 = vld [vmem:[#allocation2] sm:$0xfe]   ;;  %v5295_v7 = vld [vmem:[#allocation12 + $0x20] sm:$0xff]  }
 0x346   : > { %4777 = vmatprep.subr.bf16.mxu0 %v5662_v0  ;;  %v5273_v29 = vld [vmem:[#allocation2 + $0x8] ss:$0 sps:$4 sm:$0x11]   ;;  %v5278_v30 = vld [vmem:[#allocation2] sm:$0xfe]   ;;  %v2149_v34 = vrot.slane %v5272_v28, 1 }
 0x347   : > { %v2018_v13 = vrot.slane %v2016_v10, 1  ;;  %v2023_v14 = vrot.slane %v2021_v11, 1  ;;  %v5279_v31 = vld [vmem:[#allocation2 + $0x8] ss:$0 sps:$4 sm:$0x33]   ;;  %v2150_v35 = vrot.slane %v5273_v29, 1 }
 0x348   : > { %v2277_v36 = vshrl.u32 %v5278_v30, 16  ;;  %v2280_v37 = vshll.u32 %v5278_v30, 16  ;;  %v2285_v38 = vshrl.u32 %v5279_v31, 16  ;;  %v2288_v39 = vshll.u32 %v5279_v31, 16  ;;  %v5286_v57 = vld [vmem:[#allocation2] sm:$0xfc]  }
 0x349   : > { %4778 = vmatpush3.bf16.msra.mxu0 %v5257_v9  ;;  %v2019_v15 = vor.u32 %v2018_v13, %v2014_v12  ;;  %v2151_v42 = vsel %vm794_vm11, %v2149_v34, %v2150_v35  ;;  %v5287_v58 = vld [vmem:[#allocation2 + $0x8] ss:$0 sps:$4 sm:$0x33]   ;;  %v2417_v60 = vrot.slane %v5286_v57, 2  ;;  %v5294_v6 = vld [vmem:[#allocation12 + $0x50] sm:$0xff]   ;;  %v5297_v9 = vld [vmem:[#allocation12 + $0x28] sm:$0xff]  }
 0x34a   : > { %4779 = vmatprep.subr.bf16.mxu0 %v5662_v0  ;;  %v2279_v43 = vrot.slane %v2277_v36, 1  ;;  %v2282_v44 = vrot.slane %v2280_v37, 2  ;;  %v2287_v45 = vrot.slane %v2285_v38, 1  ;;  %v2290_v46 = vrot.slane %v2288_v39, 2  ;;  %v5293_v5 = vld [vmem:[#allocation12 + $0x18] sm:$0xff]   ;;  %v5298_v10 = vld [vmem:[#allocation12 + $0x60] sm:$0xff]  }
 0x34b   : > { %v2024_v19 = vsel %vm657_vm10, %v2019_v15, %v2023_v14  ;;  %v2418_v61 = vrot.slane %v5287_v58, 2  ;;  %v5296_v8 = vld [vmem:[#allocation12 + $0x58] sm:$0xff]   ;;  %v5299_v11 = vld [vmem:[#allocation12 + $0x30] sm:$0xff]   ;;  %v5300_v12 = vld [vmem:[#allocation12 + $0x68] sm:$0xff]  }
 0x34c   : > { %4772 = vmatmul.mubr.bf16.vlgmr.msra.gmra.mrb[20].mxu1 %v2024_v19  ;;  %v2283_v49 = vor.u32 %v2282_v44, %v2279_v43  ;;  %v2291_v50 = vor.u32 %v2290_v46, %v2287_v45  ;;  %v5301_v13 = vld [vmem:[#allocation12 + $0x38] sm:$0xff]   ;;  %v5302_v14 = vld [vmem:[#allocation12 + $0x70] sm:$0xff]   ;;  %v5304_v57 = vld [vmem:[#allocation12 + $0x80] sm:$0xff]  }
 0x34d   : > { %4796 = vmatpush3.bf16.msra.mxu1 %v5260_v16  ;;  %4780 = vmatpush3.bf16.msra.mxu0 %v5261_v17  ;;  %v2419_v62 = vsel %vm1064_vm13, %v2417_v60, %v2418_v61  ;;  %v5305_v15 = vld [vmem:[#allocation12 + $0x78] sm:$0xff]   ;;  %v5306_v61 = vld [vmem:[#allocation12 + $0x88] sm:$0xff]  }
 0x34e   : > { %4797 = vmatprep.subr.bf16.mxu1 %v5662_v0  ;;  %4781 = vmatprep.subr.bf16.mxu0 %v5662_v0  ;;  %v2292_v52 = vsel %vm922_vm12, %v2283_v49, %v2291_v50 }
 0x34f   : > { %4811 = vmatprep.mubr.msk.bf16.mxu1 %vm5664_vm0, %v5662_v0 }
 0x351   : > { %4798 = vmatpush3.bf16.msra.mxu1 %v5262_v20  ;;  %4782 = vmatpush3.bf16.msra.mxu0 %v5263_v21 }
 0x352   : > { %4799 = vmatprep.subr.bf16.mxu1 %v5662_v0  ;;  %4783 = vmatprep.subr.bf16.mxu0 %v5662_v0 }
 0x355   : > { %4800 = vmatpush3.bf16.msra.mxu1 %v5264_v22  ;;  %4784 = vmatpush3.bf16.msra.mxu0 %v5265_v23 }
 0x356   : > { %4801 = vmatprep.subr.bf16.mxu1 %v5662_v0  ;;  %4785 = vmatprep.subr.bf16.mxu0 %v5662_v0 }
 0x359   : > { %4802 = vmatpush3.bf16.msra.mxu1 %v5266_v24  ;;  %4786 = vmatpush3.bf16.msra.mxu0 %v5267_v25 }
 0x35a   : > { %4803 = vmatprep.subr.bf16.mxu1 %v5662_v0  ;;  %4787 = vmatprep.subr.bf16.mxu0 %v5662_v0 }
 0x35d   : > { %4804 = vmatpush3.bf16.msra.mxu1 %v5268_v26  ;;  %4788 = vmatpush3.bf16.msra.mxu0 %v5269_v27 }
 0x35e   : > { %4805 = vmatprep.subr.bf16.mxu1 %v5662_v0  ;;  %4789 = vmatprep.subr.bf16.mxu0 %v5662_v0 }
 0x361   : > { %4806 = vmatpush3.bf16.msra.mxu1 %v5270_v32  ;;  %4790 = vmatpush3.bf16.msra.mxu0 %v5271_v33 }
 0x362   : > { %4807 = vmatprep.subr.bf16.mxu1 %v5662_v0  ;;  %4815 = vmatprep.subr.bf16.mxu0 %v5662_v0 }
 0x364   : > { %4792 = vmatmul.mubr.bf16.vlgmr.msra.gmra.mrb[24].mxu0 %v2151_v42 }
 0x365   : > { %4808 = vmatpush3.bf16.msra.mxu1 %v5274_v40  ;;  %4816 = vmatpush3.bf16.msra.mxu0 %v5275_v41  ;;  %v4188_v40 = vld [vmem:[%s6372_s6] ss:$0 sm:$0xff] }
 0x366   : > { %4809 = vmatprep.subr.bf16.mxu1 %v5662_v0  ;;  %4817 = vmatprep.subr.bf16.mxu0 %v5662_v0 }
 0x367   : > { %4831 = vmatprep.mubr.msk.bf16.mxu0 %vm5664_vm0, %v5662_v0 }
 0x369   : > { %4810 = vmatpush3.bf16.msra.mxu1 %v5276_v47  ;;  %4818 = vmatpush3.bf16.msra.mxu0 %v5277_v48 }
 0x36a   : > { %4819 = vmatprep.subr.bf16.mxu0 %v5662_v0  ;;  %4835 = vmatprep.subr.bf16.mxu1 %v5662_v0 }
 0x36c   : > { %4812 = vmatmul.mubr.bf16.vlgmr.msra.gmra.mrb[24].mxu1 %v2292_v52 }
 0x36d   : > { %4820 = vmatpush3.bf16.msra.mxu0 %v5280_v51  ;;  %4851 = vmatprep.mubr.msk.bf16.mxu1 %vm5664_vm0, %v5662_v0 }
 0x36e   : > { %4821 = vmatprep.subr.bf16.mxu0 %v5662_v0  ;;  %4836 = vmatpush3.bf16.msra.mxu1 %v5288_v63 }
 0x36f   : > { %4837 = vmatprep.subr.bf16.mxu1 %v5662_v0 }
 0x371   : > { %4822 = vmatpush3.bf16.msra.mxu0 %v5281_v53 }
 0x372   : > { %4823 = vmatprep.subr.bf16.mxu0 %v5662_v0  ;;  %4838 = vmatpush3.bf16.msra.mxu1 %v5289_v1 }
 0x373   : > { %4839 = vmatprep.subr.bf16.mxu1 %v5662_v0 }
 0x375   : > { %4824 = vmatpush3.bf16.msra.mxu0 %v5282_v54 }
 0x376   : > { %4825 = vmatprep.subr.bf16.mxu0 %v5662_v0  ;;  %4840 = vmatpush3.bf16.msra.mxu1 %v5291_v3 }
 0x377   : > { %4841 = vmatprep.subr.bf16.mxu1 %v5662_v0 }
 0x379   : > { %4826 = vmatpush3.bf16.msra.mxu0 %v5283_v55 }
 0x37a   : > { %4827 = vmatprep.subr.bf16.mxu0 %v5662_v0  ;;  %4842 = vmatpush3.bf16.msra.mxu1 %v5293_v5  ;;  %v5309_v5 = vld [vmem:[#allocation12 + $0xc0] sm:$0xff]  }
 0x37b   : > { %4843 = vmatprep.subr.bf16.mxu1 %v5662_v0 }
 0x37d   : > { %4828 = vmatpush3.bf16.msra.mxu0 %v5284_v56 }
 0x37e   : > { %4829 = vmatprep.subr.bf16.mxu0 %v5662_v0  ;;  %4844 = vmatpush3.bf16.msra.mxu1 %v5295_v7 }
 0x37f   : > { %4845 = vmatprep.subr.bf16.mxu1 %v5662_v0 }
 0x381   : > { %4830 = vmatpush3.bf16.msra.mxu0 %v5285_v59 }
 0x382   : > { %4855 = vmatprep.subr.bf16.mxu0 %v5662_v0  ;;  %4846 = vmatpush3.bf16.msra.mxu1 %v5297_v9  ;;  %v5312_v9 = vld [vmem:[#allocation12 + $0x98] sm:$0xff]  }
 0x383   : > { %4847 = vmatprep.subr.bf16.mxu1 %v5662_v0 }
 0x384   : > { %4832 = vmatmul.mubr.bf16.vlgmr.msra.gmra.mrb[28].mxu0 %v2419_v62 }
 0x385   : > { %4871 = vmatprep.mubr.msk.bf16.mxu0 %vm5664_vm0, %v5662_v0  ;;  %4856 = vmatpush3.bf16.msra.mxu0 %v5290_v2 }
 0x386   : > { %4857 = vmatprep.subr.bf16.mxu0 %v5662_v0  ;;  %4848 = vmatpush3.bf16.msra.mxu1 %v5299_v11  ;;  %v5314_v11 = vld [vmem:[#allocation12 + $0xa0] sm:$0xff]  }
 0x387   : > { %4849 = vmatprep.subr.bf16.mxu1 %v5662_v0 }
 0x389   : > { %4858 = vmatpush3.bf16.msra.mxu0 %v5292_v4 }
 0x38a   : > { %4859 = vmatprep.subr.bf16.mxu0 %v5662_v0  ;;  %4850 = vmatpush3.bf16.msra.mxu1 %v5301_v13  ;;  %v5316_v13 = vld [vmem:[#allocation12 + $0xa8] sm:$0xff]  }
 0x38b   : > { %4875 = vmatprep.subr.bf16.mxu1 %v5662_v0 }
 0x38d   : > { %4860 = vmatpush3.bf16.msra.mxu0 %v5294_v6  ;;  %v5310_v6 = vld [vmem:[#allocation12 + $0x90] sm:$0xff]  }
 0x38e   : > { %4861 = vmatprep.subr.bf16.mxu0 %v5662_v0 }
 0x391   : > { %4862 = vmatpush3.bf16.msra.mxu0 %v5296_v8  ;;  %v5311_v8 = vld [vmem:[#allocation12 + $0xc8] sm:$0xff]  }
 0x392   : > { %4863 = vmatprep.subr.bf16.mxu0 %v5662_v0 }
 0x395   : > { %4864 = vmatpush3.bf16.msra.mxu0 %v5298_v10  ;;  %v5313_v10 = vld [vmem:[#allocation12 + $0xd0] sm:$0xff]  }
 0x396   : > { %4865 = vmatprep.subr.bf16.mxu0 %v5662_v0 }
 0x399   : > { %4866 = vmatpush3.bf16.msra.mxu0 %v5300_v12  ;;  %v5315_v12 = vld [vmem:[#allocation12 + $0xd8] sm:$0xff]  }
 0x39a   : > { %4867 = vmatprep.subr.bf16.mxu0 %v5662_v0 }
 0x39d   : > { %4868 = vmatpush3.bf16.msra.mxu0 %v5302_v14  ;;  %v5317_v14 = vld [vmem:[#allocation12 + $0xe0] sm:$0xff]  }
 0x39e   : > { %4869 = vmatprep.subr.bf16.mxu0 %v5662_v0 }
 0x3a1   : > { %4870 = vmatpush3.bf16.msra.mxu0 %v5305_v15  ;;  %v5318_v15 = vld [vmem:[#allocation12 + $0xb0] sm:$0xff]  }
 0x3a2   : > { %4895 = vmatprep.subr.bf16.mxu0 %v5662_v0 }
 0x417   : > { %v1974_v16 = vpop.f32.mrb[20].mxu0 }
 0x418   : > { %v4753_v17 = vpop.f32.mrb[21].mxu0 }
 0x419   : > { %v1977_v19 = vpop.f32.mrb[22].mxu0 }
 0x41a   : > { %v4754_v20 = vpop.f32.mrb[23].mxu0 }
 0x41f   : > { %v2108_v21 = vpop.f32.mrb[20].mxu1 }
 0x420   : > { %v2115_v22 = vadd.f32 %v2108_v21, %v1974_v16  ;;  %v4773_v23 = vpop.f32.mrb[21].mxu1  ;;  %v5319_v21 = vld [vmem:[#allocation12 + $0xe8] sm:$0xff]  }
 0x421   : > { %v2111_v24 = vpop.f32.mrb[22].mxu1 }
 0x422   : > { %v2116_v25 = vadd.f32 %v2111_v24, %v1977_v19  ;;  %v4774_v26 = vpop.f32.mrb[23].mxu1 }
 0x437   : > { %v2235_v27 = vpop.f32.mrb[24].mxu0 }
 0x438   : > { %v2242_v28 = vadd.f32 %v2235_v27, %v2115_v22  ;;  %v4793_v29 = vpop.f32.mrb[25].mxu0  ;;  %v5320_v22 = vld [vmem:[#allocation12 + $0xb8] sm:$0xff]  }
 0x439   : > { %v2238_v30 = vpop.f32.mrb[26].mxu0  ;;  %v5323_v29 = vld [vmem:[#allocation12 + $0xf0] sm:$0xff]  }
 0x43a   : > { %v2243_v31 = vadd.f32 %v2238_v30, %v2116_v25  ;;  %v4794_v32 = vpop.f32.mrb[27].mxu0  ;;  %v5324_v30 = vld [vmem:[#allocation12 + $0x100] sm:$0xff]  }
 0x43f   : > { %v2376_v33 = vpop.f32.mrb[24].mxu1 }
 0x440   : > { %v2383_v34 = vadd.f32 %v2376_v33, %v2242_v28  ;;  %v4813_v35 = vpop.f32.mrb[25].mxu1 }
 0x441   : > { %v2379_v36 = vpop.f32.mrb[26].mxu1 }
 0x442   : > { %v2384_v37 = vadd.f32 %v2379_v36, %v2243_v31  ;;  %v4814_v38 = vpop.f32.mrb[27].mxu1  ;;  %v5325_v36 = vld [vmem:[#allocation12 + $0xf8] sm:$0xff]  }
 0x457   : > { %v2503_v39 = vpop.f32.mrb[28].mxu0 }
 0x458   : > { %v2510_v41 = vadd.f32 %v2503_v39, %v2383_v34  ;;  %v4833_v42 = vpop.f32.mrb[29].mxu0 }
 0x459   : > { %v2506_v43 = vpop.f32.mrb[30].mxu0  ;;  %v5330_v42 = vld [vmem:[#allocation12 + $0x118] sm:$0xff]  }
 0x45a   : > { %v2523_v44 = vadd.f32 %v4188_v40, %v2510_v41  ;;  %v2511_v45 = vadd.f32 %v2506_v43, %v2384_v37  ;;  %v4834_v46 = vpop.f32.mrb[31].mxu0  ;;  %v5326_v37 = vld [vmem:[#allocation12 + $0x108] sm:$0xff]   ;;  %v5331_v43 = vld [vmem:[#allocation12 + $0x120] sm:$0xff]  }
 0x45c   : > { %5394 = vtanh.f32 %v2523_v44  ;;  %v2524_v47 = vadd.f32 %v4188_v40, %v2511_v45  ;;  %v5329_v40 = vld [vmem:[#allocation12 + $0x110] sm:$0xff]   ;;  %v5332_v44 = vld [vmem:[#allocation12 + $0x128] sm:$0xff]  }
 0x45d   : > { %v5333_v45 = vld [vmem:[#allocation12 + $0x130] sm:$0xff]  }
 0x45e   : > { %5396 = vtanh.f32 %v2524_v47 }
 0x466   : > { %v5395_v48 = vpop.eup %5394 }
 0x467   : > { %v4305_v49 = vpack.c.bf16 %v5395_v48, %v5395_v48  ;;  %v5334_v48 = vld [vmem:[#allocation12 + $0x138] sm:$0xff]  }
 0x468   : > { %v5397_v50 = vpop.eup %5396 }
 0x469   : > { %v2533_v51 = vrot.slane %v4305_v49, 7  ;;  %v4306_v52 = vpack.c.bf16 %v5397_v50, %v5397_v50 }
 0x46b   : > { %v2534_v53 = vrot.slane %v2533_v51, 4  ;;  %2541 = vst [vmem:[#allocation2] sm:$0xe] %v2533_v51  ;;  %v2535_v54 = vrot.slane %v4306_v52, 7  ;;  %v5337_v52 = vld [vmem:[#allocation13] sm:$0xff]  }
 0x46d   : > { %v2536_v55 = vsel %vm6017_vm7, %v2534_v53, %v2535_v54  ;;  %v2537_v56 = vrot.slane %v2535_v54, 4  ;;  %v5338_v53 = vld [vmem:[#allocation13 + $0x8] sm:$0xff]   ;;  %v5339_v54 = vld [vmem:[#allocation13 + $0x40] sm:$0xff]  }
 0x46e   : > { %2542 = vst [vmem:[#allocation2 + $0x4] sm:$0xf] %v2536_v55  ;;  %v5340_v55 = vld [vmem:[#allocation13 + $0x10] sm:$0xff]  }
 0x46f   : > { %2543 = vst [vmem:[#allocation2 + $0x8] sm:$0x1] %v2537_v56  ;;  %v5341_v56 = vld [vmem:[#allocation13 + $0x48] sm:$0xff]  }
 0x475   : > { %v5303_v58 = vld [vmem:[#allocation2] sm:$0xff]  }
 0x476   : > { %v5307_v59 = vld [vmem:[#allocation2] sm:$0xff]   ;;  %v5308_v60 = vld [vmem:[#allocation2 + $0x8] ss:$0 sps:$4 sm:$0x11]   ;;  %4852 = vmatmul.mubr.bf16.vlgmr.msra.gmra.mrb[28].mxu1 %v5303_v58 }
 0x477   : > { %4876 = vmatpush3.bf16.msra.mxu1 %v5304_v57  ;;  %v2692_v62 = vshll.u32 %v5307_v59, 16  ;;  %v2697_v63 = vshll.u32 %v5308_v60, 16  ;;  %4891 = vmatprep.mubr.msk.bf16.mxu1 %vm5664_vm0, %v5662_v0  ;;  %v2690_v1 = vshrl.u32 %v5307_v59, 16  ;;  %v5321_v16 = vld [vmem:[#allocation2] sm:$0xfe]   ;;  %v5344_v59 = vld [vmem:[#allocation13 + $0x20] sm:$0xff]  }
 0x478   : > { %4877 = vmatprep.subr.bf16.mxu1 %v5662_v0  ;;  %v5322_v17 = vld [vmem:[#allocation2 + $0x8] ss:$0 sps:$4 sm:$0x11]   ;;  %v5327_v19 = vld [vmem:[#allocation2] sm:$0xfe]   ;;  %v2825_v23 = vrot.slane %v5321_v16, 1 }
 0x479   : > { %v2694_v2 = vrot.slane %v2692_v62, 1  ;;  %v2699_v3 = vrot.slane %v2697_v63, 1  ;;  %v5328_v20 = vld [vmem:[#allocation2 + $0x8] ss:$0 sps:$4 sm:$0x33]   ;;  %v2826_v24 = vrot.slane %v5322_v17, 1 }
 0x47a   : > { %v2953_v25 = vshrl.u32 %v5327_v19, 16  ;;  %v2956_v26 = vshll.u32 %v5327_v19, 16  ;;  %v2961_v27 = vshrl.u32 %v5328_v20, 16  ;;  %v2964_v28 = vshll.u32 %v5328_v20, 16  ;;  %v5335_v46 = vld [vmem:[#allocation2] sm:$0xfc]  }
 0x47b   : > { %4878 = vmatpush3.bf16.msra.mxu1 %v5306_v61  ;;  %v2695_v4 = vor.u32 %v2694_v2, %v2690_v1  ;;  %v2827_v31 = vsel %vm794_vm11, %v2825_v23, %v2826_v24  ;;  %v5336_v47 = vld [vmem:[#allocation2 + $0x8] ss:$0 sps:$4 sm:$0x33]   ;;  %v3093_v49 = vrot.slane %v5335_v46, 2  ;;  %v5343_v58 = vld [vmem:[#allocation13 + $0x50] sm:$0xff]   ;;  %v5346_v61 = vld [vmem:[#allocation13 + $0x28] sm:$0xff]  }
 0x47c   : > { %4879 = vmatprep.subr.bf16.mxu1 %v5662_v0  ;;  %v2955_v32 = vrot.slane %v2953_v25, 1  ;;  %v2958_v33 = vrot.slane %v2956_v26, 2  ;;  %v2963_v34 = vrot.slane %v2961_v27, 1  ;;  %v2966_v35 = vrot.slane %v2964_v28, 2  ;;  %v5342_v57 = vld [vmem:[#allocation13 + $0x18] sm:$0xff]   ;;  %v5347_v62 = vld [vmem:[#allocation13 + $0x60] sm:$0xff]  }
 0x47d   : > { %v2700_v7 = vsel %vm657_vm10, %v2695_v4, %v2699_v3  ;;  %v3094_v50 = vrot.slane %v5336_v47, 2  ;;  %v5345_v60 = vld [vmem:[#allocation13 + $0x58] sm:$0xff]   ;;  %v5348_v63 = vld [vmem:[#allocation13 + $0x30] sm:$0xff]   ;;  %v5349_v1 = vld [vmem:[#allocation13 + $0x68] sm:$0xff]  }
 0x47e   : > { %4872 = vmatmul.mubr.bf16.vlgmr.msra.gmra.mrb[32].mxu0 %v2700_v7  ;;  %v2959_v38 = vor.u32 %v2958_v33, %v2955_v32  ;;  %v2967_v39 = vor.u32 %v2966_v35, %v2963_v34  ;;  %v5350_v2 = vld [vmem:[#allocation13 + $0x38] sm:$0xff]   ;;  %v5351_v3 = vld [vmem:[#allocation13 + $0x70] sm:$0xff]   ;;  %v5353_v46 = vld [vmem:[#allocation13 + $0x80] sm:$0xff]  }
 0x47f   : > { %4896 = vmatpush3.bf16.msra.mxu0 %v5309_v5  ;;  %4880 = vmatpush3.bf16.msra.mxu1 %v5310_v6  ;;  %v3095_v51 = vsel %vm1064_vm13, %v3093_v49, %v3094_v50  ;;  %v5354_v4 = vld [vmem:[#allocation13 + $0x78] sm:$0xff]   ;;  %v5355_v50 = vld [vmem:[#allocation13 + $0x88] sm:$0xff]  }
 0x480   : > { %4897 = vmatprep.subr.bf16.mxu0 %v5662_v0  ;;  %4881 = vmatprep.subr.bf16.mxu1 %v5662_v0  ;;  %v2968_v41 = vsel %vm922_vm12, %v2959_v38, %v2967_v39 }
 0x481   : > { %4911 = vmatprep.mubr.msk.bf16.mxu0 %vm5664_vm0, %v5662_v0 }
 0x483   : > { %4898 = vmatpush3.bf16.msra.mxu0 %v5311_v8  ;;  %4882 = vmatpush3.bf16.msra.mxu1 %v5312_v9 }
 0x484   : > { %4899 = vmatprep.subr.bf16.mxu0 %v5662_v0  ;;  %4883 = vmatprep.subr.bf16.mxu1 %v5662_v0 }
 0x487   : > { %4900 = vmatpush3.bf16.msra.mxu0 %v5313_v10  ;;  %4884 = vmatpush3.bf16.msra.mxu1 %v5314_v11 }
 0x488   : > { %4901 = vmatprep.subr.bf16.mxu0 %v5662_v0  ;;  %4885 = vmatprep.subr.bf16.mxu1 %v5662_v0 }
 0x48b   : > { %4902 = vmatpush3.bf16.msra.mxu0 %v5315_v12  ;;  %4886 = vmatpush3.bf16.msra.mxu1 %v5316_v13 }
 0x48c   : > { %4903 = vmatprep.subr.bf16.mxu0 %v5662_v0  ;;  %4887 = vmatprep.subr.bf16.mxu1 %v5662_v0 }
 0x48f   : > { %4904 = vmatpush3.bf16.msra.mxu0 %v5317_v14  ;;  %4888 = vmatpush3.bf16.msra.mxu1 %v5318_v15 }
 0x490   : > { %4905 = vmatprep.subr.bf16.mxu0 %v5662_v0  ;;  %4889 = vmatprep.subr.bf16.mxu1 %v5662_v0 }
 0x493   : > { %4906 = vmatpush3.bf16.msra.mxu0 %v5319_v21  ;;  %4890 = vmatpush3.bf16.msra.mxu1 %v5320_v22 }
 0x494   : > { %4907 = vmatprep.subr.bf16.mxu0 %v5662_v0  ;;  %4915 = vmatprep.subr.bf16.mxu1 %v5662_v0 }
 0x496   : > { %4892 = vmatmul.mubr.bf16.vlgmr.msra.gmra.mrb[32].mxu1 %v2827_v31 }
 0x497   : > { %4908 = vmatpush3.bf16.msra.mxu0 %v5323_v29  ;;  %4916 = vmatpush3.bf16.msra.mxu1 %v5324_v30  ;;  %v4240_v29 = vld [vmem:[%s6404_s1] ss:$0 sm:$0xff]  ;;  %s5576_s1 = sshll.u32 %s5665_s23, 4  ;;  %s5577_s1 = int_to_ptr.vmem [resolvable:$false] %s5576_s1 }
 0x498   : > { %4909 = vmatprep.subr.bf16.mxu0 %v5662_v0  ;;  %4917 = vmatprep.subr.bf16.mxu1 %v5662_v0  ;;  %s5578_s21 = scalar_lea.vmem %s5577_s1, 512  ;;  %p5579_p13 = scmp.lt.s32.totalorder %s6317_s13, %s5577_s1 }
 0x499   : > { %4931 = vmatprep.mubr.msk.bf16.mxu1 %vm5664_vm0, %v5662_v0  ;;  %p5580_p0 = scmp.lt.s32.totalorder %s5578_s21, %s5572_s15 }
 0x49b   : > { %4910 = vmatpush3.bf16.msra.mxu0 %v5325_v36  ;;  %4918 = vmatpush3.bf16.msra.mxu1 %v5326_v37  ;;  %p5581_p2 = por %p5580_p0, %p5579_p13 }
 0x49c   : > { %4919 = vmatprep.subr.bf16.mxu1 %v5662_v0  ;;  %4935 = vmatprep.subr.bf16.mxu0 %v5662_v0 }
 0x49d   : > { %p5582_p8 = pnand %p5581_p2, %p5575_p1 }
 0x49e   : > { %4912 = vmatmul.mubr.bf16.vlgmr.msra.gmra.mrb[36].mxu0 %v2968_v41 }
 0x49f   : > { %4920 = vmatpush3.bf16.msra.mxu1 %v5329_v40  ;;  %4951 = vmatprep.mubr.msk.bf16.mxu0 %vm5664_vm0, %v5662_v0 }
 0x4a0   : > { %4921 = vmatprep.subr.bf16.mxu1 %v5662_v0  ;;  %4936 = vmatpush3.bf16.msra.mxu0 %v5337_v52 }
 0x4a1   : > { %4937 = vmatprep.subr.bf16.mxu0 %v5662_v0 }
 0x4a3   : > { %4922 = vmatpush3.bf16.msra.mxu1 %v5330_v42 }
 0x4a4   : > { %4923 = vmatprep.subr.bf16.mxu1 %v5662_v0  ;;  %4938 = vmatpush3.bf16.msra.mxu0 %v5338_v53 }
 0x4a5   : > { %4939 = vmatprep.subr.bf16.mxu0 %v5662_v0 }
 0x4a7   : > { %4924 = vmatpush3.bf16.msra.mxu1 %v5331_v43 }
 0x4a8   : > { %4925 = vmatprep.subr.bf16.mxu1 %v5662_v0  ;;  %4940 = vmatpush3.bf16.msra.mxu0 %v5340_v55 }
 0x4a9   : > { %4941 = vmatprep.subr.bf16.mxu0 %v5662_v0 }
 0x4ab   : > { %4926 = vmatpush3.bf16.msra.mxu1 %v5332_v44 }
 0x4ac   : > { %4927 = vmatprep.subr.bf16.mxu1 %v5662_v0  ;;  %4942 = vmatpush3.bf16.msra.mxu0 %v5342_v57  ;;  %v5359_v57 = vld [vmem:[#allocation13 + $0x90] sm:$0xff]  }
 0x4ad   : > { %4943 = vmatprep.subr.bf16.mxu0 %v5662_v0 }
 0x4af   : > { %4928 = vmatpush3.bf16.msra.mxu1 %v5333_v45 }
 0x4b0   : > { %4929 = vmatprep.subr.bf16.mxu1 %v5662_v0  ;;  %4944 = vmatpush3.bf16.msra.mxu0 %v5344_v59  ;;  %v5360_v59 = vld [vmem:[#allocation13 + $0xc8] sm:$0xff]  }
 0x4b1   : > { %4945 = vmatprep.subr.bf16.mxu0 %v5662_v0 }
 0x4b3   : > { %4930 = vmatpush3.bf16.msra.mxu1 %v5334_v48 }
 0x4b4   : > { %4955 = vmatprep.subr.bf16.mxu1 %v5662_v0  ;;  %4946 = vmatpush3.bf16.msra.mxu0 %v5346_v61  ;;  %v5362_v61 = vld [vmem:[#allocation13 + $0xd0] sm:$0xff]  }
 0x4b5   : > { %4947 = vmatprep.subr.bf16.mxu0 %v5662_v0 }
 0x4b6   : > { %4932 = vmatmul.mubr.bf16.vlgmr.msra.gmra.mrb[36].mxu1 %v3095_v51 }
 0x4b7   : > { %4971 = vmatprep.mubr.msk.bf16.mxu1 %vm5664_vm0, %v5662_v0  ;;  %4956 = vmatpush3.bf16.msra.mxu1 %v5339_v54 }
 0x4b8   : > { %4957 = vmatprep.subr.bf16.mxu1 %v5662_v0  ;;  %4948 = vmatpush3.bf16.msra.mxu0 %v5348_v63  ;;  %v5364_v63 = vld [vmem:[#allocation13 + $0xd8] sm:$0xff]  }
 0x4b9   : > { %4949 = vmatprep.subr.bf16.mxu0 %v5662_v0 }
 0x4bb   : > { %4958 = vmatpush3.bf16.msra.mxu1 %v5341_v56  ;;  %v5358_v56 = vld [vmem:[#allocation13 + $0xc0] sm:$0xff]  }
 0x4bc   : > { %4959 = vmatprep.subr.bf16.mxu1 %v5662_v0  ;;  %4950 = vmatpush3.bf16.msra.mxu0 %v5350_v2  ;;  %v5366_v2 = vld [vmem:[#allocation13 + $0xe0] sm:$0xff]  }
 0x4bd   : > { %4975 = vmatprep.subr.bf16.mxu0 %v5662_v0 }
 0x4bf   : > { %4960 = vmatpush3.bf16.msra.mxu1 %v5343_v58 }
 0x4c0   : > { %4961 = vmatprep.subr.bf16.mxu1 %v5662_v0 }
 0x4c3   : > { %4962 = vmatpush3.bf16.msra.mxu1 %v5345_v60  ;;  %v5361_v60 = vld [vmem:[#allocation13 + $0x98] sm:$0xff]  }
 0x4c4   : > { %4963 = vmatprep.subr.bf16.mxu1 %v5662_v0 }
 0x4c7   : > { %4964 = vmatpush3.bf16.msra.mxu1 %v5347_v62  ;;  %v5363_v62 = vld [vmem:[#allocation13 + $0xa0] sm:$0xff]  }
 0x4c8   : > { %4965 = vmatprep.subr.bf16.mxu1 %v5662_v0 }
 0x4cb   : > { %4966 = vmatpush3.bf16.msra.mxu1 %v5349_v1  ;;  %v5365_v1 = vld [vmem:[#allocation13 + $0xa8] sm:$0xff]  }
 0x4cc   : > { %4967 = vmatprep.subr.bf16.mxu1 %v5662_v0 }
 0x4cf   : > { %4968 = vmatpush3.bf16.msra.mxu1 %v5351_v3  ;;  %v5367_v3 = vld [vmem:[#allocation13 + $0xb0] sm:$0xff]  }
 0x4d0   : > { %4969 = vmatprep.subr.bf16.mxu1 %v5662_v0 }
 0x4d3   : > { %4970 = vmatpush3.bf16.msra.mxu1 %v5354_v4 }
 0x4d4   : > { %4995 = vmatprep.subr.bf16.mxu1 %v5662_v0 }
 0x549   : > { %v2650_v5 = vpop.f32.mrb[28].mxu1 }
 0x54a   : > { %v4853_v6 = vpop.f32.mrb[29].mxu1 }
 0x54b   : > { %v2653_v7 = vpop.f32.mrb[30].mxu1 }
 0x54c   : > { %v4854_v8 = vpop.f32.mrb[31].mxu1 }
 0x54d   : > { %v5368_v8 = vld [vmem:[#allocation13 + $0xe8] sm:$0xff]  }
 0x551   : > { %v2784_v9 = vpop.f32.mrb[32].mxu0 }
 0x552   : > { %v2791_v10 = vadd.f32 %v2784_v9, %v2650_v5  ;;  %v4873_v11 = vpop.f32.mrb[33].mxu0  ;;  %v5369_v9 = vld [vmem:[#allocation13 + $0xb8] sm:$0xff]  }
 0x553   : > { %v2787_v12 = vpop.f32.mrb[34].mxu0 }
 0x554   : > { %v2792_v13 = vadd.f32 %v2787_v12, %v2653_v7  ;;  %v4874_v14 = vpop.f32.mrb[35].mxu0 }
 0x569   : > { %v2911_v15 = vpop.f32.mrb[32].mxu1 }
 0x56a   : > { %v2918_v16 = vadd.f32 %v2911_v15, %v2791_v10  ;;  %v4893_v17 = vpop.f32.mrb[33].mxu1 }
 0x56b   : > { %v2914_v19 = vpop.f32.mrb[34].mxu1  ;;  %v5373_v17 = vld [vmem:[#allocation13 + $0x100] sm:$0xff]  }
 0x56c   : > { %v2919_v20 = vadd.f32 %v2914_v19, %v2792_v13  ;;  %v4894_v21 = vpop.f32.mrb[35].mxu1 }
 0x571   : > { %v3052_v22 = vpop.f32.mrb[36].mxu0 }
 0x572   : > { %v3059_v23 = vadd.f32 %v3052_v22, %v2918_v16  ;;  %v4913_v24 = vpop.f32.mrb[37].mxu0  ;;  %v5372_v16 = vld [vmem:[#allocation13 + $0xf0] sm:$0xff]  }
 0x573   : > { %v3055_v25 = vpop.f32.mrb[38].mxu0  ;;  %v5374_v24 = vld [vmem:[#allocation13 + $0xf8] sm:$0xff]  }
 0x574   : > { %v3060_v26 = vadd.f32 %v3055_v25, %v2919_v20  ;;  %v4914_v27 = vpop.f32.mrb[39].mxu0  ;;  %v5375_v25 = vld [vmem:[#allocation13 + $0x108] sm:$0xff]  }
 0x589   : > { %v3179_v28 = vpop.f32.mrb[36].mxu1 }
 0x58a   : > { %v3186_v30 = vadd.f32 %v3179_v28, %v3059_v23  ;;  %v4933_v31 = vpop.f32.mrb[37].mxu1  ;;  %v5378_v28 = vld [vmem:[#allocation13 + $0x110] sm:$0xff]  }
 0x58b   : > { %v3182_v32 = vpop.f32.mrb[38].mxu1  ;;  %v5380_v31 = vld [vmem:[#allocation13 + $0x120] sm:$0xff]  }
 0x58c   : > { %v3199_v33 = vadd.f32 %v4240_v29, %v3186_v30  ;;  %v3187_v34 = vadd.f32 %v3182_v32, %v3060_v26  ;;  %v4934_v35 = vpop.f32.mrb[39].mxu1  ;;  %v5379_v30 = vld [vmem:[#allocation13 + $0x118] sm:$0xff]   ;;  %v5381_v32 = vld [vmem:[#allocation13 + $0x128] sm:$0xff]  }
 0x58e   : > { %5398 = vtanh.f32 %v3199_v33  ;;  %v3200_v36 = vadd.f32 %v4240_v29, %v3187_v34  ;;  %v5382_v33 = vld [vmem:[#allocation13 + $0x130] sm:$0xff]  }
 0x590   : > { %5400 = vtanh.f32 %v3200_v36  ;;  %v5383_v36 = vld [vmem:[#allocation13 + $0x138] sm:$0xff]  }
 0x598   : > { %v5399_v37 = vpop.eup %5398 }
 0x599   : > { %v4307_v38 = vpack.c.bf16 %v5399_v37, %v5399_v37 }
 0x59a   : > { %v5401_v39 = vpop.eup %5400 }
 0x59b   : > { %v3209_v40 = vrot.slane %v4307_v38, 7  ;;  %v4308_v41 = vpack.c.bf16 %v5401_v39, %v5401_v39 }
 0x59d   : > { %v3210_v42 = vrot.slane %v3209_v40, 4  ;;  %3217 = vst [vmem:[#allocation2] sm:$0xe] %v3209_v40  ;;  %v3211_v43 = vrot.slane %v4308_v41, 7 }
 0x59f   : > { %v3212_v44 = vsel %vm6017_vm7, %v3210_v42, %v3211_v43  ;;  %v3213_v45 = vrot.slane %v3211_v43, 4 }
 0x5a0   : > { %3218 = vst [vmem:[#allocation2 + $0x4] sm:$0xf] %v3212_v44 }
 0x5a1   : > { %3219 = vst [vmem:[#allocation2 + $0x8] sm:$0x1] %v3213_v45 }
 0x5a7   : > { %v5352_v47 = vld [vmem:[#allocation2] sm:$0xff]  }
 0x5a8   : > { %v5356_v48 = vld [vmem:[#allocation2] sm:$0xff]   ;;  %v5357_v49 = vld [vmem:[#allocation2 + $0x8] ss:$0 sps:$4 sm:$0x11]   ;;  %4952 = vmatmul.mubr.bf16.vlgmr.msra.gmra.mrb[40].mxu0 %v5352_v47 }
 0x5a9   : > { %4976 = vmatpush3.bf16.msra.mxu0 %v5353_v46  ;;  %v3368_v51 = vshll.u32 %v5356_v48, 16  ;;  %v3373_v52 = vshll.u32 %v5357_v49, 16  ;;  %4991 = vmatprep.mubr.msk.bf16.mxu0 %vm5664_vm0, %v5662_v0  ;;  %v3366_v53 = vshrl.u32 %v5356_v48, 16  ;;  %v5370_v4 = vld [vmem:[#allocation2] sm:$0xfe]  }
 0x5aa   : > { %4977 = vmatprep.subr.bf16.mxu0 %v5662_v0  ;;  %v5371_v5 = vld [vmem:[#allocation2 + $0x8] ss:$0 sps:$4 sm:$0x11]   ;;  %v5376_v6 = vld [vmem:[#allocation2] sm:$0xfe]   ;;  %v3501_v10 = vrot.slane %v5370_v4, 1 }
 0x5ab   : > { %v3370_v18 = vrot.slane %v3368_v51, 1  ;;  %v3375_v54 = vrot.slane %v3373_v52, 1  ;;  %v5377_v7 = vld [vmem:[#allocation2 + $0x8] ss:$0 sps:$4 sm:$0x33]   ;;  %v3502_v11 = vrot.slane %v5371_v5, 1 }
 0x5ac   : > { %v3629_v12 = vshrl.u32 %v5376_v6, 16  ;;  %v3632_v13 = vshll.u32 %v5376_v6, 16  ;;  %v3637_v14 = vshrl.u32 %v5377_v7, 16  ;;  %v3640_v15 = vshll.u32 %v5377_v7, 16  ;;  %v5384_v34 = vld [vmem:[#allocation2] sm:$0xfc]  }
 0x5ad   : > { %4978 = vmatpush3.bf16.msra.mxu0 %v5355_v50  ;;  %v3371_v55 = vor.u32 %v3370_v18, %v3366_v53  ;;  %v3503_v19 = vsel %vm794_vm11, %v3501_v10, %v3502_v11  ;;  %v5385_v35 = vld [vmem:[#allocation2 + $0x8] ss:$0 sps:$4 sm:$0x33]   ;;  %v3769_v37 = vrot.slane %v5384_v34, 2 }
 0x5ae   : > { %4979 = vmatprep.subr.bf16.mxu0 %v5662_v0  ;;  %v3631_v20 = vrot.slane %v3629_v12, 1  ;;  %v3634_v21 = vrot.slane %v3632_v13, 2  ;;  %v3639_v22 = vrot.slane %v3637_v14, 1  ;;  %v3642_v23 = vrot.slane %v3640_v15, 2 }
 0x5af   : > { %v3376_v58 = vsel %vm657_vm10, %v3371_v55, %v3375_v54  ;;  %v3770_v38 = vrot.slane %v5385_v35, 2 }
 0x5b0   : > { %4972 = vmatmul.mubr.bf16.vlgmr.msra.gmra.mrb[40].mxu1 %v3376_v58  ;;  %v3635_v26 = vor.u32 %v3634_v21, %v3631_v20  ;;  %v3643_v27 = vor.u32 %v3642_v23, %v3639_v22 }
 0x5b1   : > { %4996 = vmatpush3.bf16.msra.mxu1 %v5358_v56  ;;  %4980 = vmatpush3.bf16.msra.mxu0 %v5359_v57  ;;  %v3771_v39 = vsel %vm1064_vm13, %v3769_v37, %v3770_v38 }
 0x5b2   : > { %4997 = vmatprep.subr.bf16.mxu1 %v5662_v0  ;;  %4981 = vmatprep.subr.bf16.mxu0 %v5662_v0  ;;  %v3644_v29 = vsel %vm922_vm12, %v3635_v26, %v3643_v27 }
 0x5b3   : > { %5011 = vmatprep.mubr.msk.bf16.mxu1 %vm5664_vm0, %v5662_v0 }
 0x5b5   : > { %4998 = vmatpush3.bf16.msra.mxu1 %v5360_v59  ;;  %4982 = vmatpush3.bf16.msra.mxu0 %v5361_v60 }
 0x5b6   : > { %4999 = vmatprep.subr.bf16.mxu1 %v5662_v0  ;;  %4983 = vmatprep.subr.bf16.mxu0 %v5662_v0 }
 0x5b9   : > { %5000 = vmatpush3.bf16.msra.mxu1 %v5362_v61  ;;  %4984 = vmatpush3.bf16.msra.mxu0 %v5363_v62  ;;  %v4292_v61 = vld [vmem:[%s6405_s22] ss:$0 sm:$0xff] }
 0x5ba   : > { %5001 = vmatprep.subr.bf16.mxu1 %v5662_v0  ;;  %4985 = vmatprep.subr.bf16.mxu0 %v5662_v0 }
 0x5bd   : > { %5002 = vmatpush3.bf16.msra.mxu1 %v5364_v63  ;;  %4986 = vmatpush3.bf16.msra.mxu0 %v5365_v1 }
 0x5be   : > { %5003 = vmatprep.subr.bf16.mxu1 %v5662_v0  ;;  %4987 = vmatprep.subr.bf16.mxu0 %v5662_v0 }
 0x5c1   : > { %5004 = vmatpush3.bf16.msra.mxu1 %v5366_v2  ;;  %4988 = vmatpush3.bf16.msra.mxu0 %v5367_v3 }
 0x5c2   : > { %5005 = vmatprep.subr.bf16.mxu1 %v5662_v0  ;;  %4989 = vmatprep.subr.bf16.mxu0 %v5662_v0 }
 0x5c5   : > { %5006 = vmatpush3.bf16.msra.mxu1 %v5368_v8  ;;  %4990 = vmatpush3.bf16.msra.mxu0 %v5369_v9 }
 0x5c6   : > { %5007 = vmatprep.subr.bf16.mxu1 %v5662_v0  ;;  %5015 = vmatprep.subr.bf16.mxu0 %v5662_v0 }
 0x5c8   : > { %4992 = vmatmul.mubr.bf16.vlgmr.msra.gmra.mrb[44].mxu0 %v3503_v19 }
 0x5c9   : > { %5008 = vmatpush3.bf16.msra.mxu1 %v5372_v16  ;;  %5016 = vmatpush3.bf16.msra.mxu0 %v5373_v17 }
 0x5ca   : > { %5009 = vmatprep.subr.bf16.mxu1 %v5662_v0  ;;  %5017 = vmatprep.subr.bf16.mxu0 %v5662_v0 }
 0x5cb   : > { %5031 = vmatprep.mubr.msk.bf16.mxu0 %vm5664_vm0, %v5662_v0 }
 0x5cd   : > { %5010 = vmatpush3.bf16.msra.mxu1 %v5374_v24  ;;  %5018 = vmatpush3.bf16.msra.mxu0 %v5375_v25 }
 0x5ce   : > { %5019 = vmatprep.subr.bf16.mxu0 %v5662_v0 }
 0x5d0   : > { %5012 = vmatmul.mubr.bf16.vlgmr.msra.gmra.mrb[44].mxu1 %v3644_v29 }
 0x5d1   : > { %5020 = vmatpush3.bf16.msra.mxu0 %v5378_v28 }
 0x5d2   : > { %5021 = vmatprep.subr.bf16.mxu0 %v5662_v0 }
 0x5d5   : > { %5022 = vmatpush3.bf16.msra.mxu0 %v5379_v30 }
 0x5d6   : > { %5023 = vmatprep.subr.bf16.mxu0 %v5662_v0 }
 0x5d9   : > { %5024 = vmatpush3.bf16.msra.mxu0 %v5380_v31 }
 0x5da   : > { %5025 = vmatprep.subr.bf16.mxu0 %v5662_v0 }
 0x5dd   : > { %5026 = vmatpush3.bf16.msra.mxu0 %v5381_v32 }
 0x5de   : > { %5027 = vmatprep.subr.bf16.mxu0 %v5662_v0 }
 0x5e1   : > { %5028 = vmatpush3.bf16.msra.mxu0 %v5382_v33 }
 0x5e2   : > { %5029 = vmatprep.subr.bf16.mxu0 %v5662_v0 }
 0x5e5   : > { %5030 = vmatpush3.bf16.msra.mxu0 %v5383_v36 }
 0x5e8   : > { %5032 = vmatmul.mubr.bf16.vlgmr.msra.gmra.mrb[48].mxu0 %v3771_v39 }
 0x67b   : > { %v3326_v40 = vpop.f32.mrb[40].mxu0 }
 0x67c   : > { %v4953_v41 = vpop.f32.mrb[41].mxu0 }
 0x67d   : > { %v3329_v42 = vpop.f32.mrb[42].mxu0 }
 0x67e   : > { %v4954_v43 = vpop.f32.mrb[43].mxu0 }
 0x683   : > { %v3460_v44 = vpop.f32.mrb[40].mxu1 }
 0x684   : > { %v3467_v45 = vadd.f32 %v3460_v44, %v3326_v40  ;;  %v4973_v46 = vpop.f32.mrb[41].mxu1 }
 0x685   : > { %v3463_v47 = vpop.f32.mrb[42].mxu1 }
 0x686   : > { %v3468_v48 = vadd.f32 %v3463_v47, %v3329_v42  ;;  %v4974_v49 = vpop.f32.mrb[43].mxu1 }
 0x69b   : > { %v3587_v50 = vpop.f32.mrb[44].mxu0 }
 0x69c   : > { %v3594_v51 = vadd.f32 %v3587_v50, %v3467_v45  ;;  %v4993_v0 = vpop.f32.mrb[45].mxu0 }
 0x69d   : > { %v3590_v52 = vpop.f32.mrb[46].mxu0 }
 0x69e   : > { %v3595_v53 = vadd.f32 %v3590_v52, %v3468_v48  ;;  %v4994_v18 = vpop.f32.mrb[47].mxu0 }
 0x6a3   : > { %v3728_v54 = vpop.f32.mrb[44].mxu1 }
 0x6a4   : > { %v3735_v55 = vadd.f32 %v3728_v54, %v3594_v51  ;;  %v5013_v56 = vpop.f32.mrb[45].mxu1 }
 0x6a5   : > { %v3731_v57 = vpop.f32.mrb[46].mxu1 }
 0x6a6   : > { %v3736_v58 = vadd.f32 %v3731_v57, %v3595_v53  ;;  %v5014_v59 = vpop.f32.mrb[47].mxu1 }
 0x6bb   : > { %v3855_v60 = vpop.f32.mrb[48].mxu0 }
 0x6bc   : > { %v3862_v62 = vadd.f32 %v3855_v60, %v3735_v55  ;;  %v5033_v63 = vpop.f32.mrb[49].mxu0 }
 0x6bd   : > { %v3858_v1 = vpop.f32.mrb[50].mxu0 }
 0x6be   : > { %v3875_v2 = vadd.f32 %v4292_v61, %v3862_v62  ;;  %v3863_v3 = vadd.f32 %v3858_v1, %v3736_v58  ;;  %v5034_v4 = vpop.f32.mrb[51].mxu0 }
 0x6c0   : > { %3877 = vst [vmem:[%s477_s24] sm:$0xff] %v3875_v2  ;;  %v3876_v5 = vadd.f32 %v4292_v61, %v3863_v3 }
 0x6c2   : > { %3878 = vst [vmem:[%s477_s24 + $0x8] sm:$0xff] %v3876_v5 }
 0x6c3   : > { %5585 = shalt.err (!%p5582_p8)
}
 0x6c4   : > { %s5586_s12 = scalar_lea.hbm %s6322_s8, 256  ;;  %s5590_s26 = scalar_lea.hbm %s6406_s27, 512 }
 0x6c5   : > { %p5587_p6 = scmp.ne.s32.totalorder %s6322_s8, %s5586_s12  ;;  %p5591_p3 = scmp.lt.u32.totalorder %s6322_s8, %s6406_s27 }
 0x6c6   : > { %p5592_p5 = scmp.lt.u32.totalorder %s5590_s26, %s5586_s12  ;;  %p5594_p7 = scmp.lt.u32.totalorder %s5586_s12, %s6322_s8 }
 0x6c7   : > { %p5588_p10 = pnand %p5587_p6, %p6407_p4 }
 0x6c8   : > { %p5593_p9 = por %p5592_p5, %p5591_p3 }
 0x6c9   : > { %p5589_p11 = pneg %p5588_p10 }
 0x6ca   : > { %p5595_p12 = por %p5594_p7, %p5593_p9 }
 0x6cc   : > { %p5596_p1 = pnand %p5595_p12, %p5589_p11 }
 0x6ce   : > { %5599 = shalt.err (!%p5596_p1)
}
 0x6cf   : > { %s5666_s15 = smov 128   ;;  %s5667_s23 = smov 8  }
 0x6d0   : > { %5057 = dma.vmem_to_hbm [thread:$0]  (%p6407_p4), %s6317_s13, 256, %s6322_s8, %s3880_s28, %s5666_s15, %s5666_s15, %s5667_s23  }
 0x6d1 PF: > { %s3908_s1 = sand.u32 1, %s5638_s17   ;;  %p6408_p13 = scmp.ne.s32.totalorder %s6393_s14, 0 }
 0x6d2   : > { %p6409_p0 = scmp.ge.s32.totalorder %s5650_s20, 2  ;;  %s3909_s21 = scalar_lea.sflag [#allocation6], %s3908_s1 }
 0x6d4   : > { %p5080_p2 = pnand %p6409_p0, %p6408_p13 }
 0x6d6   : > { %5633 = dma.done.wait (!%p5080_p2), %s3909_s21, 256  }
 0x6d7   : > { %5635 = vsyncadd (!%p5080_p2), %s3909_s21, 4294967040  ;;  %p27_p8 = scmp.ge.s32.totalorder %s5901_s16, 4   ;;  %s6410_s17 = smov %s5642_s18 }
 0x6d8   : > { %s6411_s18 = smov %s5646_s19  ;;  %s6412_s19 = smov %s5913_s10 }
 0x6d9   : > { %s6413_s20 = smov %s5901_s16  ;;  %29 = sbr.rel (!%p27_p8) target bundleno = 13 (0xd), region = 149 }
 0x6e0   :  { %3914 = vsyncpa [#allocation5], 1 }
 0x6e1   :  { %3916 = vsyncpa [#allocation5 + $0x1], 1 }
 0x6e2   :  { %3917 = vsyncpa [#allocation8], 1 }
 0x6e3   :  { %3918 = vsyncpa [#allocation11], 1 }
 0x6e4   :  { %3919 = vsyncpa [#allocation14], 1 }
 0x6e5   :  { %3920 = vsyncpa [#allocation6], 1 }
 0x6e6   :  { %3922 = vsyncpa [#allocation6 + $0x1], 1 }

</bundles_post_ra>
